<compile_context>
chip_gen: v6e
topology: v6e:2x2x1
jax: 0.10.0
libtpu: 0.0.40
codegen_flags: <defaults>
</compile_context>

<pallas_src>
import math
import functools

import jax
import jax.numpy as jnp
from jax import lax
from jax.experimental import pallas as pl
from jax.experimental.pallas import tpu as pltpu


# ----------------------------- in-kernel helpers -----------------------------

def _layernorm(x, g, b, eps=1e-6):
    # x: (S, E), g/b: (E,)
    mu = jnp.mean(x, axis=-1, keepdims=True)
    var = jnp.mean((x - mu) ** 2, axis=-1, keepdims=True)
    return (x - mu) * lax.rsqrt(var + eps) * g + b          # rsqrt -> EUP slot


def _gelu_exact(x):
    # PyTorch nn.GELU() default (erf-based, exact)
    return 0.5 * x * (1.0 + lax.erf(x * (1.0 / math.sqrt(2.0))))


def _mha(q_in, kv_in, addmask, wq, bq, wkv, bkv, wo, bo, *, num_heads, scale, mmdt):
    """Multi-head attention with packed full-lane projections.

    q_in: (S,E) query side (already layernormed); kv_in: (K,E).
    addmask: (S,K) additive mask (0 keep / -1e9 masked).
    wq: (E,E), bq: (E,), wkv: (E,2E), bkv: (2E,), wo: (E,E), bo: (E,).
    """
    S, E = q_in.shape
    K = kv_in.shape[0]
    H = num_heads
    hd = E // H

    # One full-lane matmul for Q, one for packed K|V.
    q = jnp.dot(q_in.astype(mmdt), wq, preferred_element_type=jnp.float32) + bq
    q = q * scale               # fold 1/sqrt(embed_dim) into q (incl. bias, as in ref)
    kv = jnp.dot(kv_in.astype(mmdt), wkv, preferred_element_type=jnp.float32) + bkv
    k = kv[:, :E]
    v = kv[:, E:]

    # Split heads only for the batched score / context matmuls.
    qh = q.reshape(S, H, hd).swapaxes(0, 1).astype(mmdt)    # (H, S, hd)
    kh = k.reshape(K, H, hd).swapaxes(0, 1).astype(mmdt)    # (H, K, hd)
    vh = v.reshape(K, H, hd).swapaxes(0, 1).astype(mmdt)    # (H, K, hd)

    s = jnp.einsum('hqd,hkd->hqk', qh, kh, preferred_element_type=jnp.float32)
    s = s + addmask[None]                                   # additive mask
    m = jnp.max(s, axis=-1, keepdims=True)
    p = jnp.exp(s - m)
    w = p / jnp.sum(p, axis=-1, keepdims=True)              # exact f32 softmax
    ctx = jnp.einsum('hqk,hkd->hqd', w.astype(mmdt), vh,
                     preferred_element_type=jnp.float32)    # (H, S, hd)

    # Re-pack heads and do ONE (S, H*hd) @ (E, E) output projection.
    o = ctx.swapaxes(0, 1).reshape(S, E)
    return jnp.dot(o.astype(mmdt), wo, preferred_element_type=jnp.float32) + bo


def _attn_block(x, kv_src, addmask, prm, num_heads, scale, mmdt):
    # prm = (ln_gamma, ln_beta, wq, bq, wkv, bkv, wo, bo) refs
    g, be, wq, bq, wkv, bkv, wo, bo = prm
    y = _layernorm(x, g[0], be[0])
    kv_in = y if kv_src is None else kv_src                 # self-attn uses LN(x) as kv
    o = _mha(y, kv_in, addmask,
             wq[...], bq[0], wkv[...], bkv[0], wo[...], bo[0],
             num_heads=num_heads, scale=scale, mmdt=mmdt)
    return x + o                                            # residual (dropout = identity)


# ----------------------------- fused decoder-layer kernel ---------------------

def _make_decoder_kernel(num_heads, scale, has_cross, smask_batched, cmask_batched, mmdt):
    def kernel(*args):
        out_ref = args[-1]
        it = iter(args[:-1])
        x = next(it)[0]                                     # (S, E)
        enc = next(it)[0] if has_cross else None            # (Senc, E)
        sm = next(it)
        smask = sm[0] if smask_batched else sm[...]         # (S, S) additive
        if has_cross:
            cm = next(it)
            cmask = cm[0] if cmask_batched else cm[...]     # (S, Senc) additive
        sa = [next(it) for _ in range(8)]
        ca = [next(it) for _ in range(8)] if has_cross else None
        g3, be3, w1, b1, w2, b2 = (next(it) for _ in range(6))

        # ----- self-attention block -----
        x = _attn_block(x, None, smask, sa, num_heads, scale, mmdt)

        # ----- cross-attention block -----
        if has_cross:
            x = _attn_block(x, enc, cmask, ca, num_heads, scale, mmdt)

        # ----- feed-forward block -----
        y = _layernorm(x, g3[0], be3[0])
        h = jnp.dot(y.astype(mmdt), w1[...], preferred_element_type=jnp.float32) + b1[0]
        h = _gelu_exact(h)
        o = jnp.dot(h.astype(mmdt), w2[...], preferred_element_type=jnp.float32) + b2[0]
        out_ref[0] = (x + o).astype(out_ref.dtype)          # residual (dropout = identity)

    return kernel


# ----------------------------- pallas_call wrapper -----------------------------

def _batch_spec(a):
    nd = a.ndim
    return pl.BlockSpec((1,) + tuple(a.shape[1:]),
                        lambda b, _n=nd: (b,) + (0,) * (_n - 1))


def _full_spec(a):
    nd = a.ndim
    return pl.BlockSpec(tuple(a.shape), lambda b, _n=nd: (0,) * _n)


def _prep_attn(prm, mmdt):
    """Fuse packed K/V projections into one (E,2E) matrix (wrapper side)."""
    g, be, wq, bq, wk, bk, wv, bv, wo, bo = prm
    wkv = jnp.concatenate([wk, wv], axis=1)                 # (E, 2E)
    bkv = jnp.concatenate([bk, bv], axis=1)                 # (1, 2E)
    return (g, be, wq.astype(mmdt), bq, wkv.astype(mmdt), bkv, wo.astype(mmdt), bo)


def _prep_ffn(prm, mmdt):
    g, be, w1, b1, w2, b2 = prm
    return (g, be, w1.astype(mmdt), b1, w2.astype(mmdt), b2)


def _cost_estimate(B, S, E, F, H, Senc, has_cross):
    def attn_flops(K):
        return (2 * S * E * E            # q projection
                + 2 * K * E * 2 * E      # packed k/v projection
                + 2 * S * K * E          # scores   (H*S*K*hd)
                + 2 * S * K * E          # context  (H*S*K*hd)
                + 2 * S * E * E)         # output projection
    flops = attn_flops(S) + (attn_flops(Senc) if has_cross else 0) + 2 * (2 * S * E * F)
    trans = H * S * S + (H * S * Senc if has_cross else 0) + S * F   # exp + erf
    n_attn = 2 if has_cross else 1
    w_elems = n_attn * (E * E + E * 2 * E + E * E + 6 * E) + (2 * E * F + F + 3 * E)
    act_elems = B * S * E * 2 + (B * Senc * E if has_cross else 0)
    mask_elems = S * S + (S * Senc if has_cross else 0)
    return pl.CostEstimate(
        flops=int(B * flops),
        transcendentals=int(B * trans),
        bytes_accessed=int((w_elems + act_elems + mask_elems) * 4))


def transformer_decoder_layer(x, mask, params, encoder_out=None, encoder_mask=None,
                              *, num_heads, matmul_dtype=jnp.float32):
    """matmul_dtype=jnp.bfloat16 enables bf16 MXU operands / f32 accumulation
    (recommended for v6e/v7x at production sizes); default f32 keeps exact
    parity with the PyTorch reference."""
    B, S, E = x.shape
    assert E % num_heads == 0
    scale = 1.0 / math.sqrt(E)          # reference quirk: 1/sqrt(embed_dim)
    has_cross = encoder_out is not None
    Senc = encoder_out.shape[1] if has_cross else 0
    F = params["ffn"][2].shape[1]
    f32 = jnp.float32

    # Additive masks precomputed once in the wrapper: 0 = keep, -1e9 = masked.
    if mask is None:
        addm_self = jnp.zeros((S, S), f32)
    else:
        addm_self = (mask.astype(f32) - 1.0) * 1e9
    smask_batched = addm_self.ndim == 3

    inputs = [x]
    in_specs = [_batch_spec(x)]
    if has_cross:
        inputs.append(encoder_out)
        in_specs.append(_batch_spec(encoder_out))
    inputs.append(addm_self)
    in_specs.append(_batch_spec(addm_self) if smask_batched else _full_spec(addm_self))

    cmask_batched = False
    if has_cross:
        if encoder_mask is None:
            addm_cross = jnp.zeros((S, Senc), f32)
        else:
            addm_cross = (encoder_mask.astype(f32) - 1.0) * 1e9
        cmask_batched = addm_cross.ndim == 3
        inputs.append(addm_cross)
        in_specs.append(_batch_spec(addm_cross) if cmask_batched
                        else _full_spec(addm_cross))

    def add_weights(prm_list):
        for a in prm_list:
            inputs.append(a)
            in_specs.append(_full_spec(a))   # constant index_map -> no re-DMA per step

    add_weights(_prep_attn(params["self_attn"], matmul_dtype))
    if has_cross:
        add_weights(_prep_attn(params["cross_attn"], matmul_dtype))
    add_weights(_prep_ffn(params["ffn"], matmul_dtype))

    kernel = _make_decoder_kernel(num_heads, scale, has_cross,
                                  smask_batched, cmask_batched, matmul_dtype)
    return pl.pallas_call(
        kernel,
        out_shape=jax.ShapeDtypeStruct(x.shape, x.dtype),
        grid=(B,),
        in_specs=in_specs,
        out_specs=_batch_spec(x),
        compiler_params=pltpu.CompilerParams(dimension_semantics=("parallel",)),
        cost_estimate=_cost_estimate(B, S, E, F, num_heads, Senc, has_cross),
    )(*inputs)


# ----------------------------- deterministic parameter init -------------------

def _init_attn_params(key, E):
    ks = jax.random.split(key, 8)
    f = jnp.float32
    return (
        jnp.ones((1, E), f),                                   # ln gamma
        jnp.zeros((1, E), f),                                  # ln beta
        jax.random.normal(ks[0], (E, E), f) * 0.05,            # Wq (heads packed in cols)
        jax.random.normal(ks[1], (1, E), f) * 0.05,            # bq
        jax.random.normal(ks[2], (E, E), f) * 0.05,            # Wk
        jax.random.normal(ks[3], (1, E), f) * 0.05,            # bk
        jax.random.normal(ks[4], (E, E), f) * 0.05,            # Wv
        jax.random.normal(ks[5], (1, E), f) * 0.05,            # bv
        jax.random.normal(ks[6], (E, E), f) * 0.05,            # Wo
        jax.random.normal(ks[7], (1, E), f) * 0.05,            # bo
    )


def _init_ffn_params(key, E, F):
    ks = jax.random.split(key, 4)
    f = jnp.float32
    return (
        jnp.ones((1, E), f),                                   # ln gamma
        jnp.zeros((1, E), f),                                  # ln beta
        jax.random.normal(ks[0], (E, F), f) * 0.05,            # W1
        jax.random.normal(ks[1], (1, F), f) * 0.05,            # b1
        jax.random.normal(ks[2], (F, E), f) * 0.05,            # W2
        jax.random.normal(ks[3], (1, E), f) * 0.05,            # b2
    )


# ----------------------------- main -------------------------------------------

if __name__ == "__main__":
    B, S, E, H, FILT = 2, 8, 32, 4, 64      # batch, seq, embed_dim, head_size, filter_dim
    S_ENC = 8                               # encoder sequence length
    # dropout_rate = 0.1
    # TODO(synk): training-mode dropout not implemented (identity at inference).

    root = jax.random.PRNGKey(0)
    k_x, k_enc, k_p1, k_p2, k_p3 = jax.random.split(root, 5)

    x = jax.random.normal(k_x, (B, S, E), jnp.float32)
    encoder_out = jax.random.normal(k_enc, (B, S_ENC, E), jnp.float32)

    # Un-batched masks (broadcast over batch, as the PyTorch masked_fill would):
    # causal self-attention mask (S, S): 1 = keep, 0 = masked.
    mask = jnp.tril(jnp.ones((S, S), jnp.float32))
    # Encoder mask: attend to everything.
    encoder_mask = jnp.ones((S, S_ENC), jnp.float32)

    params = {
        "self_attn": _init_attn_params(k_p1, E),
        "cross_attn": _init_attn_params(k_p2, E),
        "ffn": _init_ffn_params(k_p3, E, FILT),
    }

    fwd = jax.jit(functools.partial(transformer_decoder_layer, num_heads=H))
    out = fwd(x, mask, params, encoder_out, encoder_mask)
    jax.block_until_ready(out)
    assert out.shape == (B, S, E) and out.dtype == jnp.float32
    assert bool(jnp.all(jnp.isfinite(out)))
    print("KERNEL_OK")
</pallas_src>

<mosaic_0001>
module attributes {stable_mosaic.version = 11 : i64} {
  func.func @kernel(%arg0: i32, %arg1: memref<1x8x32xf32, #tpu.memory_space<vmem>>, %arg2: memref<1x8x32xf32, #tpu.memory_space<vmem>>, %arg3: memref<8x8xf32, #tpu.memory_space<vmem>>, %arg4: memref<8x8xf32, #tpu.memory_space<vmem>>, %arg5: memref<1x32xf32, #tpu.memory_space<vmem>>, %arg6: memref<1x32xf32, #tpu.memory_space<vmem>>, %arg7: memref<32x32xf32, #tpu.memory_space<vmem>>, %arg8: memref<1x32xf32, #tpu.memory_space<vmem>>, %arg9: memref<32x64xf32, #tpu.memory_space<vmem>>, %arg10: memref<1x64xf32, #tpu.memory_space<vmem>>, %arg11: memref<32x32xf32, #tpu.memory_space<vmem>>, %arg12: memref<1x32xf32, #tpu.memory_space<vmem>>, %arg13: memref<1x32xf32, #tpu.memory_space<vmem>>, %arg14: memref<1x32xf32, #tpu.memory_space<vmem>>, %arg15: memref<32x32xf32, #tpu.memory_space<vmem>>, %arg16: memref<1x32xf32, #tpu.memory_space<vmem>>, %arg17: memref<32x64xf32, #tpu.memory_space<vmem>>, %arg18: memref<1x64xf32, #tpu.memory_space<vmem>>, %arg19: memref<32x32xf32, #tpu.memory_space<vmem>>, %arg20: memref<1x32xf32, #tpu.memory_space<vmem>>, %arg21: memref<1x32xf32, #tpu.memory_space<vmem>>, %arg22: memref<1x32xf32, #tpu.memory_space<vmem>>, %arg23: memref<32x64xf32, #tpu.memory_space<vmem>>, %arg24: memref<1x64xf32, #tpu.memory_space<vmem>>, %arg25: memref<64x32xf32, #tpu.memory_space<vmem>>, %arg26: memref<1x32xf32, #tpu.memory_space<vmem>>, %arg27: memref<1x8x32xf32, #tpu.memory_space<vmem>>) attributes {dimension_semantics = [#tpu.dimension_semantics<parallel>], iteration_bounds = array<i64: 2>, scalar_prefetch = 0 : i64, scratch_operands = 0 : i64, tpu.core_type = #tpu.core_type<tc>, window_params = [{transform_indices = @transform_0, window_bounds = array<i64: 1, 8, 32>}, {transform_indices = @transform_1, window_bounds = array<i64: 1, 8, 32>}, {pipeline_mode = #tpu.pipeline_mode<synchronous>, transform_indices = @transform_2, window_bounds = array<i64: 8, 8>}, {pipeline_mode = #tpu.pipeline_mode<synchronous>, transform_indices = @transform_3, window_bounds = array<i64: 8, 8>}, {pipeline_mode = #tpu.pipeline_mode<synchronous>, transform_indices = @transform_4, window_bounds = array<i64: 1, 32>}, {pipeline_mode = #tpu.pipeline_mode<synchronous>, transform_indices = @transform_5, window_bounds = array<i64: 1, 32>}, {pipeline_mode = #tpu.pipeline_mode<synchronous>, transform_indices = @transform_6, window_bounds = array<i64: 32, 32>}, {pipeline_mode = #tpu.pipeline_mode<synchronous>, transform_indices = @transform_7, window_bounds = array<i64: 1, 32>}, {pipeline_mode = #tpu.pipeline_mode<synchronous>, transform_indices = @transform_8, window_bounds = array<i64: 32, 64>}, {pipeline_mode = #tpu.pipeline_mode<synchronous>, transform_indices = @transform_9, window_bounds = array<i64: 1, 64>}, {pipeline_mode = #tpu.pipeline_mode<synchronous>, transform_indices = @transform_10, window_bounds = array<i64: 32, 32>}, {pipeline_mode = #tpu.pipeline_mode<synchronous>, transform_indices = @transform_11, window_bounds = array<i64: 1, 32>}, {pipeline_mode = #tpu.pipeline_mode<synchronous>, transform_indices = @transform_12, window_bounds = array<i64: 1, 32>}, {pipeline_mode = #tpu.pipeline_mode<synchronous>, transform_indices = @transform_13, window_bounds = array<i64: 1, 32>}, {pipeline_mode = #tpu.pipeline_mode<synchronous>, transform_indices = @transform_14, window_bounds = array<i64: 32, 32>}, {pipeline_mode = #tpu.pipeline_mode<synchronous>, transform_indices = @transform_15, window_bounds = array<i64: 1, 32>}, {pipeline_mode = #tpu.pipeline_mode<synchronous>, transform_indices = @transform_16, window_bounds = array<i64: 32, 64>}, {pipeline_mode = #tpu.pipeline_mode<synchronous>, transform_indices = @transform_17, window_bounds = array<i64: 1, 64>}, {pipeline_mode = #tpu.pipeline_mode<synchronous>, transform_indices = @transform_18, window_bounds = array<i64: 32, 32>}, {pipeline_mode = #tpu.pipeline_mode<synchronous>, transform_indices = @transform_19, window_bounds = array<i64: 1, 32>}, {pipeline_mode = #tpu.pipeline_mode<synchronous>, transform_indices = @transform_20, window_bounds = array<i64: 1, 32>}, {pipeline_mode = #tpu.pipeline_mode<synchronous>, transform_indices = @transform_21, window_bounds = array<i64: 1, 32>}, {pipeline_mode = #tpu.pipeline_mode<synchronous>, transform_indices = @transform_22, window_bounds = array<i64: 32, 64>}, {pipeline_mode = #tpu.pipeline_mode<synchronous>, transform_indices = @transform_23, window_bounds = array<i64: 1, 64>}, {pipeline_mode = #tpu.pipeline_mode<synchronous>, transform_indices = @transform_24, window_bounds = array<i64: 64, 32>}, {pipeline_mode = #tpu.pipeline_mode<synchronous>, transform_indices = @transform_25, window_bounds = array<i64: 1, 32>}, {transform_indices = @transform_26, window_bounds = array<i64: 1, 8, 32>}]} {
    %c0 = arith.constant 0 : index
    %c0_0 = arith.constant 0 : index
    %c0_1 = arith.constant 0 : index
    %0 = vector.load %arg1[%c0, %c0_0, %c0_1] : memref<1x8x32xf32, #tpu.memory_space<vmem>>, vector<1x8x32xf32>
    %1 = vector.shape_cast %0 : vector<1x8x32xf32> to vector<8x32xf32>
    %c0_2 = arith.constant 0 : index
    %c0_3 = arith.constant 0 : index
    %c0_4 = arith.constant 0 : index
    %2 = vector.load %arg2[%c0_2, %c0_3, %c0_4] : memref<1x8x32xf32, #tpu.memory_space<vmem>>, vector<1x8x32xf32>
    %3 = vector.shape_cast %2 : vector<1x8x32xf32> to vector<8x32xf32>
    %c0_5 = arith.constant 0 : index
    %c0_6 = arith.constant 0 : index
    %4 = vector.load %arg3[%c0_5, %c0_6] : memref<8x8xf32, #tpu.memory_space<vmem>>, vector<8x8xf32>
    %c0_7 = arith.constant 0 : index
    %c0_8 = arith.constant 0 : index
    %5 = vector.load %arg4[%c0_7, %c0_8] : memref<8x8xf32, #tpu.memory_space<vmem>>, vector<8x8xf32>
    %c0_9 = arith.constant 0 : index
    %c0_10 = arith.constant 0 : index
    %6 = vector.load %arg5[%c0_9, %c0_10] : memref<1x32xf32, #tpu.memory_space<vmem>>, vector<1x32xf32>
    %7 = vector.shape_cast %6 : vector<1x32xf32> to vector<32xf32>
    %c0_11 = arith.constant 0 : index
    %c0_12 = arith.constant 0 : index
    %8 = vector.load %arg6[%c0_11, %c0_12] : memref<1x32xf32, #tpu.memory_space<vmem>>, vector<1x32xf32>
    %9 = vector.shape_cast %8 : vector<1x32xf32> to vector<32xf32>
    %cst = arith.constant dense<0.000000e+00> : vector<8xf32>
    %10 = vector.multi_reduction <add>, %1, %cst [1] : vector<8x32xf32> to vector<8xf32>
    %11 = vector.shape_cast %10 : vector<8xf32> to vector<8x1xf32>
    %cst_13 = arith.constant 3.200000e+01 : f32
    %12 = vector.broadcast %cst_13 : f32 to vector<8x1xf32>
    %13 = arith.divf %11, %12 : vector<8x1xf32>
    %14 = vector.broadcast %13 : vector<8x1xf32> to vector<8x32xf32>
    %15 = arith.subf %1, %14 : vector<8x32xf32>
    %16 = arith.mulf %15, %15 : vector<8x32xf32>
    %cst_14 = arith.constant dense<0.000000e+00> : vector<8xf32>
    %17 = vector.multi_reduction <add>, %16, %cst_14 [1] : vector<8x32xf32> to vector<8xf32>
    %18 = vector.shape_cast %17 : vector<8xf32> to vector<8x1xf32>
    %cst_15 = arith.constant 3.200000e+01 : f32
    %19 = vector.broadcast %cst_15 : f32 to vector<8x1xf32>
    %20 = arith.divf %18, %19 : vector<8x1xf32>
    %21 = vector.broadcast %13 : vector<8x1xf32> to vector<8x32xf32>
    %22 = arith.subf %1, %21 : vector<8x32xf32>
    %cst_16 = arith.constant 9.99999997E-7 : f32
    %23 = vector.broadcast %cst_16 : f32 to vector<8x1xf32>
    %24 = arith.addf %20, %23 : vector<8x1xf32>
    %25 = math.rsqrt %24 : vector<8x1xf32>
    %26 = vector.broadcast %25 : vector<8x1xf32> to vector<8x32xf32>
    %27 = arith.mulf %22, %26 : vector<8x32xf32>
    %28 = vector.shape_cast %7 : vector<32xf32> to vector<1x32xf32>
    %29 = vector.broadcast %28 : vector<1x32xf32> to vector<8x32xf32>
    %30 = arith.mulf %27, %29 : vector<8x32xf32>
    %31 = vector.shape_cast %9 : vector<32xf32> to vector<1x32xf32>
    %32 = vector.broadcast %31 : vector<1x32xf32> to vector<8x32xf32>
    %33 = arith.addf %30, %32 : vector<8x32xf32>
    %c0_17 = arith.constant 0 : index
    %c0_18 = arith.constant 0 : index
    %34 = vector.load %arg7[%c0_17, %c0_18] : memref<32x32xf32, #tpu.memory_space<vmem>>, vector<32x32xf32>
    %c0_19 = arith.constant 0 : index
    %c0_20 = arith.constant 0 : index
    %35 = vector.load %arg8[%c0_19, %c0_20] : memref<1x32xf32, #tpu.memory_space<vmem>>, vector<1x32xf32>
    %36 = vector.shape_cast %35 : vector<1x32xf32> to vector<32xf32>
    %c0_21 = arith.constant 0 : index
    %c0_22 = arith.constant 0 : index
    %37 = vector.load %arg9[%c0_21, %c0_22] : memref<32x64xf32, #tpu.memory_space<vmem>>, vector<32x64xf32>
    %c0_23 = arith.constant 0 : index
    %c0_24 = arith.constant 0 : index
    %38 = vector.load %arg10[%c0_23, %c0_24] : memref<1x64xf32, #tpu.memory_space<vmem>>, vector<1x64xf32>
    %39 = vector.shape_cast %38 : vector<1x64xf32> to vector<64xf32>
    %c0_25 = arith.constant 0 : index
    %c0_26 = arith.constant 0 : index
    %40 = vector.load %arg11[%c0_25, %c0_26] : memref<32x32xf32, #tpu.memory_space<vmem>>, vector<32x32xf32>
    %c0_27 = arith.constant 0 : index
    %c0_28 = arith.constant 0 : index
    %41 = vector.load %arg12[%c0_27, %c0_28] : memref<1x32xf32, #tpu.memory_space<vmem>>, vector<1x32xf32>
    %42 = vector.shape_cast %41 : vector<1x32xf32> to vector<32xf32>
    %cst_29 = arith.constant dense<0.000000e+00> : vector<8x32xf32>
    %43 = tpu.matmul %33, %34, %cst_29 {dimension_numbers = #tpu.dot_dimension_numbers<[1], [0], [0], [1], [0, 0, 1, 1], [], []>} : vector<8x32xf32>, vector<32x32xf32>, vector<8x32xf32> -> vector<8x32xf32>
    %44 = vector.shape_cast %36 : vector<32xf32> to vector<1x32xf32>
    %45 = vector.broadcast %44 : vector<1x32xf32> to vector<8x32xf32>
    %46 = arith.addf %43, %45 : vector<8x32xf32>
    %cst_30 = arith.constant 0.176776692 : f32
    %47 = vector.broadcast %cst_30 : f32 to vector<8x32xf32>
    %48 = arith.mulf %46, %47 : vector<8x32xf32>
    %cst_31 = arith.constant dense<0.000000e+00> : vector<8x64xf32>
    %49 = tpu.matmul %33, %37, %cst_31 {dimension_numbers = #tpu.dot_dimension_numbers<[1], [0], [0], [1], [0, 0, 1, 1], [], []>} : vector<8x32xf32>, vector<32x64xf32>, vector<8x64xf32> -> vector<8x64xf32>
    %50 = vector.shape_cast %39 : vector<64xf32> to vector<1x64xf32>
    %51 = vector.broadcast %50 : vector<1x64xf32> to vector<8x64xf32>
    %52 = arith.addf %49, %51 : vector<8x64xf32>
    %53 = vector.extract_strided_slice %52 {offsets = [0, 0], sizes = [8, 32], strides = [1, 1]} : vector<8x64xf32> to vector<8x32xf32>
    %54 = vector.extract_strided_slice %52 {offsets = [0, 32], sizes = [8, 32], strides = [1, 1]} : vector<8x64xf32> to vector<8x32xf32>
    %55 = vector.shape_cast %48 : vector<8x32xf32> to vector<8x4x8xf32>
    %56 = tpu.transpose %55, [1, 0, 2] : vector<8x4x8xf32> -> vector<4x8x8xf32>
    %57 = vector.shape_cast %53 : vector<8x32xf32> to vector<8x4x8xf32>
    %58 = tpu.transpose %57, [1, 0, 2] : vector<8x4x8xf32> -> vector<4x8x8xf32>
    %59 = vector.shape_cast %54 : vector<8x32xf32> to vector<8x4x8xf32>
    %60 = tpu.transpose %59, [1, 0, 2] : vector<8x4x8xf32> -> vector<4x8x8xf32>
    "tpu.trace_start"() <{level = 10 : i32, message = "hqd,hkd->hqk"}> : () -> ()
    %cst_32 = arith.constant dense<0.000000e+00> : vector<4x8x8xf32>
    %61 = tpu.matmul %56, %58, %cst_32 {dimension_numbers = #tpu.dot_dimension_numbers<[2], [2], [1], [1], [0, 0, 0, 1, 1, 1], [0], [0]>} : vector<4x8x8xf32>, vector<4x8x8xf32>, vector<4x8x8xf32> -> vector<4x8x8xf32>
    "tpu.trace_stop"() : () -> ()
    %62 = vector.shape_cast %4 : vector<8x8xf32> to vector<1x8x8xf32>
    %63 = vector.broadcast %62 : vector<1x8x8xf32> to vector<4x8x8xf32>
    %64 = arith.addf %61, %63 : vector<4x8x8xf32>
    %cst_33 = arith.constant dense<0xFF800000> : vector<4x8xf32>
    %65 = vector.multi_reduction <maximumf>, %64, %cst_33 [2] : vector<4x8x8xf32> to vector<4x8xf32>
    %66 = vector.shape_cast %65 : vector<4x8xf32> to vector<4x8x1xf32>
    %67 = vector.broadcast %66 : vector<4x8x1xf32> to vector<4x8x8xf32>
    %68 = arith.subf %64, %67 : vector<4x8x8xf32>
    %69 = math.exp %68 : vector<4x8x8xf32>
    %cst_34 = arith.constant dense<0.000000e+00> : vector<4x8xf32>
    %70 = vector.multi_reduction <add>, %69, %cst_34 [2] : vector<4x8x8xf32> to vector<4x8xf32>
    %71 = vector.shape_cast %70 : vector<4x8xf32> to vector<4x8x1xf32>
    %72 = vector.broadcast %71 : vector<4x8x1xf32> to vector<4x8x8xf32>
    %73 = arith.divf %69, %72 : vector<4x8x8xf32>
    "tpu.trace_start"() <{level = 10 : i32, message = "hqk,hkd->hqd"}> : () -> ()
    %cst_35 = arith.constant dense<0.000000e+00> : vector<4x8x8xf32>
    %74 = tpu.matmul %73, %60, %cst_35 {dimension_numbers = #tpu.dot_dimension_numbers<[2], [1], [1], [2], [0, 0, 0, 1, 1, 2], [0], [0]>} : vector<4x8x8xf32>, vector<4x8x8xf32>, vector<4x8x8xf32> -> vector<4x8x8xf32>
    "tpu.trace_stop"() : () -> ()
    %75 = tpu.transpose %74, [1, 0, 2] : vector<4x8x8xf32> -> vector<8x4x8xf32>
    %76 = vector.shape_cast %75 : vector<8x4x8xf32> to vector<8x32xf32>
    %cst_36 = arith.constant dense<0.000000e+00> : vector<8x32xf32>
    %77 = tpu.matmul %76, %40, %cst_36 {dimension_numbers = #tpu.dot_dimension_numbers<[1], [0], [0], [1], [0, 0, 1, 1], [], []>} : vector<8x32xf32>, vector<32x32xf32>, vector<8x32xf32> -> vector<8x32xf32>
    %78 = vector.shape_cast %42 : vector<32xf32> to vector<1x32xf32>
    %79 = vector.broadcast %78 : vector<1x32xf32> to vector<8x32xf32>
    %80 = arith.addf %77, %79 : vector<8x32xf32>
    %81 = arith.addf %1, %80 : vector<8x32xf32>
    %c0_37 = arith.constant 0 : index
    %c0_38 = arith.constant 0 : index
    %82 = vector.load %arg13[%c0_37, %c0_38] : memref<1x32xf32, #tpu.memory_space<vmem>>, vector<1x32xf32>
    %83 = vector.shape_cast %82 : vector<1x32xf32> to vector<32xf32>
    %c0_39 = arith.constant 0 : index
    %c0_40 = arith.constant 0 : index
    %84 = vector.load %arg14[%c0_39, %c0_40] : memref<1x32xf32, #tpu.memory_space<vmem>>, vector<1x32xf32>
    %85 = vector.shape_cast %84 : vector<1x32xf32> to vector<32xf32>
    %cst_41 = arith.constant dense<0.000000e+00> : vector<8xf32>
    %86 = vector.multi_reduction <add>, %81, %cst_41 [1] : vector<8x32xf32> to vector<8xf32>
    %87 = vector.shape_cast %86 : vector<8xf32> to vector<8x1xf32>
    %cst_42 = arith.constant 3.200000e+01 : f32
    %88 = vector.broadcast %cst_42 : f32 to vector<8x1xf32>
    %89 = arith.divf %87, %88 : vector<8x1xf32>
    %90 = vector.broadcast %89 : vector<8x1xf32> to vector<8x32xf32>
    %91 = arith.subf %81, %90 : vector<8x32xf32>
    %92 = arith.mulf %91, %91 : vector<8x32xf32>
    %cst_43 = arith.constant dense<0.000000e+00> : vector<8xf32>
    %93 = vector.multi_reduction <add>, %92, %cst_43 [1] : vector<8x32xf32> to vector<8xf32>
    %94 = vector.shape_cast %93 : vector<8xf32> to vector<8x1xf32>
    %cst_44 = arith.constant 3.200000e+01 : f32
    %95 = vector.broadcast %cst_44 : f32 to vector<8x1xf32>
    %96 = arith.divf %94, %95 : vector<8x1xf32>
    %97 = vector.broadcast %89 : vector<8x1xf32> to vector<8x32xf32>
    %98 = arith.subf %81, %97 : vector<8x32xf32>
    %cst_45 = arith.constant 9.99999997E-7 : f32
    %99 = vector.broadcast %cst_45 : f32 to vector<8x1xf32>
    %100 = arith.addf %96, %99 : vector<8x1xf32>
    %101 = math.rsqrt %100 : vector<8x1xf32>
    %102 = vector.broadcast %101 : vector<8x1xf32> to vector<8x32xf32>
    %103 = arith.mulf %98, %102 : vector<8x32xf32>
    %104 = vector.shape_cast %83 : vector<32xf32> to vector<1x32xf32>
    %105 = vector.broadcast %104 : vector<1x32xf32> to vector<8x32xf32>
    %106 = arith.mulf %103, %105 : vector<8x32xf32>
    %107 = vector.shape_cast %85 : vector<32xf32> to vector<1x32xf32>
    %108 = vector.broadcast %107 : vector<1x32xf32> to vector<8x32xf32>
    %109 = arith.addf %106, %108 : vector<8x32xf32>
    %c0_46 = arith.constant 0 : index
    %c0_47 = arith.constant 0 : index
    %110 = vector.load %arg15[%c0_46, %c0_47] : memref<32x32xf32, #tpu.memory_space<vmem>>, vector<32x32xf32>
    %c0_48 = arith.constant 0 : index
    %c0_49 = arith.constant 0 : index
    %111 = vector.load %arg16[%c0_48, %c0_49] : memref<1x32xf32, #tpu.memory_space<vmem>>, vector<1x32xf32>
    %112 = vector.shape_cast %111 : vector<1x32xf32> to vector<32xf32>
    %c0_50 = arith.constant 0 : index
    %c0_51 = arith.constant 0 : index
    %113 = vector.load %arg17[%c0_50, %c0_51] : memref<32x64xf32, #tpu.memory_space<vmem>>, vector<32x64xf32>
    %c0_52 = arith.constant 0 : index
    %c0_53 = arith.constant 0 : index
    %114 = vector.load %arg18[%c0_52, %c0_53] : memref<1x64xf32, #tpu.memory_space<vmem>>, vector<1x64xf32>
    %115 = vector.shape_cast %114 : vector<1x64xf32> to vector<64xf32>
    %c0_54 = arith.constant 0 : index
    %c0_55 = arith.constant 0 : index
    %116 = vector.load %arg19[%c0_54, %c0_55] : memref<32x32xf32, #tpu.memory_space<vmem>>, vector<32x32xf32>
    %c0_56 = arith.constant 0 : index
    %c0_57 = arith.constant 0 : index
    %117 = vector.load %arg20[%c0_56, %c0_57] : memref<1x32xf32, #tpu.memory_space<vmem>>, vector<1x32xf32>
    %118 = vector.shape_cast %117 : vector<1x32xf32> to vector<32xf32>
    %cst_58 = arith.constant dense<0.000000e+00> : vector<8x32xf32>
    %119 = tpu.matmul %109, %110, %cst_58 {dimension_numbers = #tpu.dot_dimension_numbers<[1], [0], [0], [1], [0, 0, 1, 1], [], []>} : vector<8x32xf32>, vector<32x32xf32>, vector<8x32xf32> -> vector<8x32xf32>
    %120 = vector.shape_cast %112 : vector<32xf32> to vector<1x32xf32>
    %121 = vector.broadcast %120 : vector<1x32xf32> to vector<8x32xf32>
    %122 = arith.addf %119, %121 : vector<8x32xf32>
    %cst_59 = arith.constant 0.176776692 : f32
    %123 = vector.broadcast %cst_59 : f32 to vector<8x32xf32>
    %124 = arith.mulf %122, %123 : vector<8x32xf32>
    %cst_60 = arith.constant dense<0.000000e+00> : vector<8x64xf32>
    %125 = tpu.matmul %3, %113, %cst_60 {dimension_numbers = #tpu.dot_dimension_numbers<[1], [0], [0], [1], [0, 0, 1, 1], [], []>} : vector<8x32xf32>, vector<32x64xf32>, vector<8x64xf32> -> vector<8x64xf32>
    %126 = vector.shape_cast %115 : vector<64xf32> to vector<1x64xf32>
    %127 = vector.broadcast %126 : vector<1x64xf32> to vector<8x64xf32>
    %128 = arith.addf %125, %127 : vector<8x64xf32>
    %129 = vector.extract_strided_slice %128 {offsets = [0, 0], sizes = [8, 32], strides = [1, 1]} : vector<8x64xf32> to vector<8x32xf32>
    %130 = vector.extract_strided_slice %128 {offsets = [0, 32], sizes = [8, 32], strides = [1, 1]} : vector<8x64xf32> to vector<8x32xf32>
    %131 = vector.shape_cast %124 : vector<8x32xf32> to vector<8x4x8xf32>
    %132 = tpu.transpose %131, [1, 0, 2] : vector<8x4x8xf32> -> vector<4x8x8xf32>
    %133 = vector.shape_cast %129 : vector<8x32xf32> to vector<8x4x8xf32>
    %134 = tpu.transpose %133, [1, 0, 2] : vector<8x4x8xf32> -> vector<4x8x8xf32>
    %135 = vector.shape_cast %130 : vector<8x32xf32> to vector<8x4x8xf32>
    %136 = tpu.transpose %135, [1, 0, 2] : vector<8x4x8xf32> -> vector<4x8x8xf32>
    "tpu.trace_start"() <{level = 10 : i32, message = "hqd,hkd->hqk"}> : () -> ()
    %cst_61 = arith.constant dense<0.000000e+00> : vector<4x8x8xf32>
    %137 = tpu.matmul %132, %134, %cst_61 {dimension_numbers = #tpu.dot_dimension_numbers<[2], [2], [1], [1], [0, 0, 0, 1, 1, 1], [0], [0]>} : vector<4x8x8xf32>, vector<4x8x8xf32>, vector<4x8x8xf32> -> vector<4x8x8xf32>
    "tpu.trace_stop"() : () -> ()
    %138 = vector.shape_cast %5 : vector<8x8xf32> to vector<1x8x8xf32>
    %139 = vector.broadcast %138 : vector<1x8x8xf32> to vector<4x8x8xf32>
    %140 = arith.addf %137, %139 : vector<4x8x8xf32>
    %cst_62 = arith.constant dense<0xFF800000> : vector<4x8xf32>
    %141 = vector.multi_reduction <maximumf>, %140, %cst_62 [2] : vector<4x8x8xf32> to vector<4x8xf32>
    %142 = vector.shape_cast %141 : vector<4x8xf32> to vector<4x8x1xf32>
    %143 = vector.broadcast %142 : vector<4x8x1xf32> to vector<4x8x8xf32>
    %144 = arith.subf %140, %143 : vector<4x8x8xf32>
    %145 = math.exp %144 : vector<4x8x8xf32>
    %cst_63 = arith.constant dense<0.000000e+00> : vector<4x8xf32>
    %146 = vector.multi_reduction <add>, %145, %cst_63 [2] : vector<4x8x8xf32> to vector<4x8xf32>
    %147 = vector.shape_cast %146 : vector<4x8xf32> to vector<4x8x1xf32>
    %148 = vector.broadcast %147 : vector<4x8x1xf32> to vector<4x8x8xf32>
    %149 = arith.divf %145, %148 : vector<4x8x8xf32>
    "tpu.trace_start"() <{level = 10 : i32, message = "hqk,hkd->hqd"}> : () -> ()
    %cst_64 = arith.constant dense<0.000000e+00> : vector<4x8x8xf32>
    %150 = tpu.matmul %149, %136, %cst_64 {dimension_numbers = #tpu.dot_dimension_numbers<[2], [1], [1], [2], [0, 0, 0, 1, 1, 2], [0], [0]>} : vector<4x8x8xf32>, vector<4x8x8xf32>, vector<4x8x8xf32> -> vector<4x8x8xf32>
    "tpu.trace_stop"() : () -> ()
    %151 = tpu.transpose %150, [1, 0, 2] : vector<4x8x8xf32> -> vector<8x4x8xf32>
    %152 = vector.shape_cast %151 : vector<8x4x8xf32> to vector<8x32xf32>
    %cst_65 = arith.constant dense<0.000000e+00> : vector<8x32xf32>
    %153 = tpu.matmul %152, %116, %cst_65 {dimension_numbers = #tpu.dot_dimension_numbers<[1], [0], [0], [1], [0, 0, 1, 1], [], []>} : vector<8x32xf32>, vector<32x32xf32>, vector<8x32xf32> -> vector<8x32xf32>
    %154 = vector.shape_cast %118 : vector<32xf32> to vector<1x32xf32>
    %155 = vector.broadcast %154 : vector<1x32xf32> to vector<8x32xf32>
    %156 = arith.addf %153, %155 : vector<8x32xf32>
    %157 = arith.addf %81, %156 : vector<8x32xf32>
    %c0_66 = arith.constant 0 : index
    %c0_67 = arith.constant 0 : index
    %158 = vector.load %arg21[%c0_66, %c0_67] : memref<1x32xf32, #tpu.memory_space<vmem>>, vector<1x32xf32>
    %159 = vector.shape_cast %158 : vector<1x32xf32> to vector<32xf32>
    %c0_68 = arith.constant 0 : index
    %c0_69 = arith.constant 0 : index
    %160 = vector.load %arg22[%c0_68, %c0_69] : memref<1x32xf32, #tpu.memory_space<vmem>>, vector<1x32xf32>
    %161 = vector.shape_cast %160 : vector<1x32xf32> to vector<32xf32>
    %cst_70 = arith.constant dense<0.000000e+00> : vector<8xf32>
    %162 = vector.multi_reduction <add>, %157, %cst_70 [1] : vector<8x32xf32> to vector<8xf32>
    %163 = vector.shape_cast %162 : vector<8xf32> to vector<8x1xf32>
    %cst_71 = arith.constant 3.200000e+01 : f32
    %164 = vector.broadcast %cst_71 : f32 to vector<8x1xf32>
    %165 = arith.divf %163, %164 : vector<8x1xf32>
    %166 = vector.broadcast %165 : vector<8x1xf32> to vector<8x32xf32>
    %167 = arith.subf %157, %166 : vector<8x32xf32>
    %168 = arith.mulf %167, %167 : vector<8x32xf32>
    %cst_72 = arith.constant dense<0.000000e+00> : vector<8xf32>
    %169 = vector.multi_reduction <add>, %168, %cst_72 [1] : vector<8x32xf32> to vector<8xf32>
    %170 = vector.shape_cast %169 : vector<8xf32> to vector<8x1xf32>
    %cst_73 = arith.constant 3.200000e+01 : f32
    %171 = vector.broadcast %cst_73 : f32 to vector<8x1xf32>
    %172 = arith.divf %170, %171 : vector<8x1xf32>
    %173 = vector.broadcast %165 : vector<8x1xf32> to vector<8x32xf32>
    %174 = arith.subf %157, %173 : vector<8x32xf32>
    %cst_74 = arith.constant 9.99999997E-7 : f32
    %175 = vector.broadcast %cst_74 : f32 to vector<8x1xf32>
    %176 = arith.addf %172, %175 : vector<8x1xf32>
    %177 = math.rsqrt %176 : vector<8x1xf32>
    %178 = vector.broadcast %177 : vector<8x1xf32> to vector<8x32xf32>
    %179 = arith.mulf %174, %178 : vector<8x32xf32>
    %180 = vector.shape_cast %159 : vector<32xf32> to vector<1x32xf32>
    %181 = vector.broadcast %180 : vector<1x32xf32> to vector<8x32xf32>
    %182 = arith.mulf %179, %181 : vector<8x32xf32>
    %183 = vector.shape_cast %161 : vector<32xf32> to vector<1x32xf32>
    %184 = vector.broadcast %183 : vector<1x32xf32> to vector<8x32xf32>
    %185 = arith.addf %182, %184 : vector<8x32xf32>
    %c0_75 = arith.constant 0 : index
    %c0_76 = arith.constant 0 : index
    %186 = vector.load %arg23[%c0_75, %c0_76] : memref<32x64xf32, #tpu.memory_space<vmem>>, vector<32x64xf32>
    %cst_77 = arith.constant dense<0.000000e+00> : vector<8x64xf32>
    %187 = tpu.matmul %185, %186, %cst_77 {dimension_numbers = #tpu.dot_dimension_numbers<[1], [0], [0], [1], [0, 0, 1, 1], [], []>} : vector<8x32xf32>, vector<32x64xf32>, vector<8x64xf32> -> vector<8x64xf32>
    %c0_78 = arith.constant 0 : index
    %c0_79 = arith.constant 0 : index
    %188 = vector.load %arg24[%c0_78, %c0_79] : memref<1x64xf32, #tpu.memory_space<vmem>>, vector<1x64xf32>
    %189 = vector.shape_cast %188 : vector<1x64xf32> to vector<64xf32>
    %190 = vector.shape_cast %189 : vector<64xf32> to vector<1x64xf32>
    %191 = vector.broadcast %190 : vector<1x64xf32> to vector<8x64xf32>
    %192 = arith.addf %187, %191 : vector<8x64xf32>
    %cst_80 = arith.constant 5.000000e-01 : f32
    %193 = vector.broadcast %cst_80 : f32 to vector<8x64xf32>
    %194 = arith.mulf %193, %192 : vector<8x64xf32>
    %cst_81 = arith.constant 0.707106769 : f32
    %195 = vector.broadcast %cst_81 : f32 to vector<8x64xf32>
    %196 = arith.mulf %192, %195 : vector<8x64xf32>
    %197 = math.erf %196 : vector<8x64xf32>
    %cst_82 = arith.constant 1.000000e+00 : f32
    %198 = vector.broadcast %cst_82 : f32 to vector<8x64xf32>
    %199 = arith.addf %198, %197 : vector<8x64xf32>
    %200 = arith.mulf %194, %199 : vector<8x64xf32>
    %c0_83 = arith.constant 0 : index
    %c0_84 = arith.constant 0 : index
    %201 = vector.load %arg25[%c0_83, %c0_84] : memref<64x32xf32, #tpu.memory_space<vmem>>, vector<64x32xf32>
    %cst_85 = arith.constant dense<0.000000e+00> : vector<8x32xf32>
    %202 = tpu.matmul %200, %201, %cst_85 {dimension_numbers = #tpu.dot_dimension_numbers<[1], [0], [0], [1], [0, 0, 1, 1], [], []>} : vector<8x64xf32>, vector<64x32xf32>, vector<8x32xf32> -> vector<8x32xf32>
    %c0_86 = arith.constant 0 : index
    %c0_87 = arith.constant 0 : index
    %203 = vector.load %arg26[%c0_86, %c0_87] : memref<1x32xf32, #tpu.memory_space<vmem>>, vector<1x32xf32>
    %204 = vector.shape_cast %203 : vector<1x32xf32> to vector<32xf32>
    %205 = vector.shape_cast %204 : vector<32xf32> to vector<1x32xf32>
    %206 = vector.broadcast %205 : vector<1x32xf32> to vector<8x32xf32>
    %207 = arith.addf %202, %206 : vector<8x32xf32>
    %208 = arith.addf %157, %207 : vector<8x32xf32>
    %c0_88 = arith.constant 0 : index
    %c0_89 = arith.constant 0 : index
    %c0_90 = arith.constant 0 : index
    %209 = vector.load %arg27[%c0_88, %c0_89, %c0_90] : memref<1x8x32xf32, #tpu.memory_space<vmem>>, vector<1x8x32xf32>
    %210 = vector.shape_cast %209 : vector<1x8x32xf32> to vector<8x32xf32>
    %211 = vector.shape_cast %208 : vector<8x32xf32> to vector<1x8x32xf32>
    tpu.vector_store %arg27[%c0_88, %c0_89, %c0_90], %211 {strides = array<i32>} : memref<1x8x32xf32, #tpu.memory_space<vmem>>, vector<1x8x32xf32>,
    return
  }
  func.func @transform_0(%arg0: i32) -> (i32, i32, i32) {
    %c0_i32 = arith.constant 0 : i32
    %c0_i32_0 = arith.constant 0 : i32
    %c0_i32_1 = arith.constant 0 : i32
    return %arg0, %c0_i32, %c0_i32_0 : i32, i32, i32
  }
  func.func @transform_1(%arg0: i32) -> (i32, i32, i32) {
    %c0_i32 = arith.constant 0 : i32
    %c0_i32_0 = arith.constant 0 : i32
    %c0_i32_1 = arith.constant 0 : i32
    return %arg0, %c0_i32, %c0_i32_0 : i32, i32, i32
  }
  func.func @transform_2(%arg0: i32) -> (i32, i32) {
    %c0_i32 = arith.constant 0 : i32
    %c0_i32_0 = arith.constant 0 : i32
    %c0_i32_1 = arith.constant 0 : i32
    return %c0_i32, %c0_i32_0 : i32, i32
  }
  func.func @transform_3(%arg0: i32) -> (i32, i32) {
    %c0_i32 = arith.constant 0 : i32
    %c0_i32_0 = arith.constant 0 : i32
    %c0_i32_1 = arith.constant 0 : i32
    return %c0_i32, %c0_i32_0 : i32, i32
  }
  func.func @transform_4(%arg0: i32) -> (i32, i32) {
    %c0_i32 = arith.constant 0 : i32
    %c0_i32_0 = arith.constant 0 : i32
    %c0_i32_1 = arith.constant 0 : i32
    return %c0_i32, %c0_i32_0 : i32, i32
  }
  func.func @transform_5(%arg0: i32) -> (i32, i32) {
    %c0_i32 = arith.constant 0 : i32
    %c0_i32_0 = arith.constant 0 : i32
    %c0_i32_1 = arith.constant 0 : i32
    return %c0_i32, %c0_i32_0 : i32, i32
  }
  func.func @transform_6(%arg0: i32) -> (i32, i32) {
    %c0_i32 = arith.constant 0 : i32
    %c0_i32_0 = arith.constant 0 : i32
    %c0_i32_1 = arith.constant 0 : i32
    return %c0_i32, %c0_i32_0 : i32, i32
  }
  func.func @transform_7(%arg0: i32) -> (i32, i32) {
    %c0_i32 = arith.constant 0 : i32
    %c0_i32_0 = arith.constant 0 : i32
    %c0_i32_1 = arith.constant 0 : i32
    return %c0_i32, %c0_i32_0 : i32, i32
  }
  func.func @transform_8(%arg0: i32) -> (i32, i32) {
    %c0_i32 = arith.constant 0 : i32
    %c0_i32_0 = arith.constant 0 : i32
    %c0_i32_1 = arith.constant 0 : i32
    return %c0_i32, %c0_i32_0 : i32, i32
  }
  func.func @transform_9(%arg0: i32) -> (i32, i32) {
    %c0_i32 = arith.constant 0 : i32
    %c0_i32_0 = arith.constant 0 : i32
    %c0_i32_1 = arith.constant 0 : i32
    return %c0_i32, %c0_i32_0 : i32, i32
  }
  func.func @transform_10(%arg0: i32) -> (i32, i32) {
    %c0_i32 = arith.constant 0 : i32
    %c0_i32_0 = arith.constant 0 : i32
    %c0_i32_1 = arith.constant 0 : i32
    return %c0_i32, %c0_i32_0 : i32, i32
  }
  func.func @transform_11(%arg0: i32) -> (i32, i32) {
    %c0_i32 = arith.constant 0 : i32
    %c0_i32_0 = arith.constant 0 : i32
    %c0_i32_1 = arith.constant 0 : i32
    return %c0_i32, %c0_i32_0 : i32, i32
  }
  func.func @transform_12(%arg0: i32) -> (i32, i32) {
    %c0_i32 = arith.constant 0 : i32
    %c0_i32_0 = arith.constant 0 : i32
    %c0_i32_1 = arith.constant 0 : i32
    return %c0_i32, %c0_i32_0 : i32, i32
  }
  func.func @transform_13(%arg0: i32) -> (i32, i32) {
    %c0_i32 = arith.constant 0 : i32
    %c0_i32_0 = arith.constant 0 : i32
    %c0_i32_1 = arith.constant 0 : i32
    return %c0_i32, %c0_i32_0 : i32, i32
  }
  func.func @transform_14(%arg0: i32) -> (i32, i32) {
    %c0_i32 = arith.constant 0 : i32
    %c0_i32_0 = arith.constant 0 : i32
    %c0_i32_1 = arith.constant 0 : i32
    return %c0_i32, %c0_i32_0 : i32, i32
  }
  func.func @transform_15(%arg0: i32) -> (i32, i32) {
    %c0_i32 = arith.constant 0 : i32
    %c0_i32_0 = arith.constant 0 : i32
    %c0_i32_1 = arith.constant 0 : i32
    return %c0_i32, %c0_i32_0 : i32, i32
  }
  func.func @transform_16(%arg0: i32) -> (i32, i32) {
    %c0_i32 = arith.constant 0 : i32
    %c0_i32_0 = arith.constant 0 : i32
    %c0_i32_1 = arith.constant 0 : i32
    return %c0_i32, %c0_i32_0 : i32, i32
  }
  func.func @transform_17(%arg0: i32) -> (i32, i32) {
    %c0_i32 = arith.constant 0 : i32
    %c0_i32_0 = arith.constant 0 : i32
    %c0_i32_1 = arith.constant 0 : i32
    return %c0_i32, %c0_i32_0 : i32, i32
  }
  func.func @transform_18(%arg0: i32) -> (i32, i32) {
    %c0_i32 = arith.constant 0 : i32
    %c0_i32_0 = arith.constant 0 : i32
    %c0_i32_1 = arith.constant 0 : i32
    return %c0_i32, %c0_i32_0 : i32, i32
  }
  func.func @transform_19(%arg0: i32) -> (i32, i32) {
    %c0_i32 = arith.constant 0 : i32
    %c0_i32_0 = arith.constant 0 : i32
    %c0_i32_1 = arith.constant 0 : i32
    return %c0_i32, %c0_i32_0 : i32, i32
  }
  func.func @transform_20(%arg0: i32) -> (i32, i32) {
    %c0_i32 = arith.constant 0 : i32
    %c0_i32_0 = arith.constant 0 : i32
    %c0_i32_1 = arith.constant 0 : i32
    return %c0_i32, %c0_i32_0 : i32, i32
  }
  func.func @transform_21(%arg0: i32) -> (i32, i32) {
    %c0_i32 = arith.constant 0 : i32
    %c0_i32_0 = arith.constant 0 : i32
    %c0_i32_1 = arith.constant 0 : i32
    return %c0_i32, %c0_i32_0 : i32, i32
  }
  func.func @transform_22(%arg0: i32) -> (i32, i32) {
    %c0_i32 = arith.constant 0 : i32
    %c0_i32_0 = arith.constant 0 : i32
    %c0_i32_1 = arith.constant 0 : i32
    return %c0_i32, %c0_i32_0 : i32, i32
  }
  func.func @transform_23(%arg0: i32) -> (i32, i32) {
    %c0_i32 = arith.constant 0 : i32
    %c0_i32_0 = arith.constant 0 : i32
    %c0_i32_1 = arith.constant 0 : i32
    return %c0_i32, %c0_i32_0 : i32, i32
  }
  func.func @transform_24(%arg0: i32) -> (i32, i32) {
    %c0_i32 = arith.constant 0 : i32
    %c0_i32_0 = arith.constant 0 : i32
    %c0_i32_1 = arith.constant 0 : i32
    return %c0_i32, %c0_i32_0 : i32, i32
  }
  func.func @transform_25(%arg0: i32) -> (i32, i32) {
    %c0_i32 = arith.constant 0 : i32
    %c0_i32_0 = arith.constant 0 : i32
    %c0_i32_1 = arith.constant 0 : i32
    return %c0_i32, %c0_i32_0 : i32, i32
  }
  func.func @transform_26(%arg0: i32) -> (i32, i32, i32) {
    %c0_i32 = arith.constant 0 : i32
    %c0_i32_0 = arith.constant 0 : i32
    %c0_i32_1 = arith.constant 0 : i32
    return %arg0, %c0_i32, %c0_i32_0 : i32, i32, i32
  }
}

</mosaic_0001>

<bundles_post_ra>
// kernel: transformer_decoder_layer.1
= control target key start
LH: loop header
LB: loop body
LE: loop exit
PB: predicated region body
PF: predicated region fallthrough
CT: control target
= control target key end

     0   :  { %s5424_s0 = inlined_call_operand.vmem [shape: f32[2,8,32], index: 0, kind: input, shape index: {}]   ;;  %s5425_s1 = inlined_call_operand.vmem [shape: f32[2,8,32], index: 1, kind: input, shape index: {}]   ;;  %s5426_s2 = inlined_call_operand.vmem [shape: f32[8,8], index: 2, kind: input, shape index: {}]   ;;  %s5427_s3 = inlined_call_operand.vmem [shape: f32[8,8], index: 3, kind: input, shape index: {}]   ;;  %s5428_s4 = inlined_call_operand.vmem [shape: f32[1,32], index: 4, kind: input, shape index: {}]   ;;  %s5429_s5 = inlined_call_operand.vmem [shape: f32[1,32], index: 5, kind: input, shape index: {}]   ;;  %s5430_s6 = inlined_call_operand.vmem [shape: f32[32,32], index: 6, kind: input, shape index: {}]   ;;  %s5431_s7 = inlined_call_operand.vmem [shape: f32[1,32], index: 7, kind: input, shape index: {}]   ;;  %s5432_s8 = inlined_call_operand.vmem [shape: f32[32,64], index: 8, kind: input, shape index: {}]   ;;  %s5433_s9 = inlined_call_operand.vmem [shape: f32[1,64], index: 9, kind: input, shape index: {}]   ;;  %s5434_s10 = inlined_call_operand.vmem [shape: f32[32,32], index: 10, kind: input, shape index: {}]   ;;  %s5435_s11 = inlined_call_operand.vmem [shape: f32[1,32], index: 11, kind: input, shape index: {}]   ;;  %s5436_s12 = inlined_call_operand.vmem [shape: f32[1,32], index: 12, kind: input, shape index: {}]   ;;  %s5437_s13 = inlined_call_operand.vmem [shape: f32[1,32], index: 13, kind: input, shape index: {}]   ;;  %s5438_s14 = inlined_call_operand.vmem [shape: f32[32,32], index: 14, kind: input, shape index: {}]   ;;  %s5439_s15 = inlined_call_operand.vmem [shape: f32[1,32], index: 15, kind: input, shape index: {}]   ;;  %s5440_s16 = inlined_call_operand.vmem [shape: f32[32,64], index: 16, kind: input, shape index: {}]   ;;  %s5441_s17 = inlined_call_operand.vmem [shape: f32[1,64], index: 17, kind: input, shape index: {}]   ;;  %s5442_s18 = inlined_call_operand.vmem [shape: f32[32,32], index: 18, kind: input, shape index: {}]   ;;  %s5443_s19 = inlined_call_operand.vmem [shape: f32[1,32], index: 19, kind: input, shape index: {}]   ;;  %s5444_s20 = inlined_call_operand.vmem [shape: f32[1,32], index: 20, kind: input, shape index: {}]   ;;  %s5445_s21 = inlined_call_operand.vmem [shape: f32[1,32], index: 21, kind: input, shape index: {}]   ;;  %s5446_s22 = inlined_call_operand.vmem [shape: f32[32,64], index: 22, kind: input, shape index: {}]   ;;  %s5447_s23 = inlined_call_operand.vmem [shape: f32[1,64], index: 23, kind: input, shape index: {}]   ;;  %s5448_s24 = inlined_call_operand.vmem [shape: f32[64,32], index: 24, kind: input, shape index: {}]   ;;  %s5449_s25 = inlined_call_operand.vmem [shape: f32[1,32], index: 25, kind: input, shape index: {}]   ;;  %s5450_s26 = inlined_call_operand.hbm [shape: f32[2,8,32], index: 26, kind: output, shape index: {}]  }
   0x1   :  { %5474 = sst [smem:[#allocation11_spill]] %s5424_s0 }
   0x2   :  { %5475 = sst [smem:[#allocation12_spill]] %s5425_s1 }
   0x3   :  { %5476 = sst [smem:[#allocation13_spill]] %s5426_s2 }
   0x4   :  { %5477 = sst [smem:[#allocation14_spill]] %s5427_s3 }
   0x5   :  { %5478 = sst [smem:[#allocation15_spill]] %s5428_s4 }
   0x6   :  { %5479 = sst [smem:[#allocation16_spill]] %s5429_s5 }
   0x7   :  { %5480 = sst [smem:[#allocation17_spill]] %s5430_s6 }
   0x8   :  { %5481 = sst [smem:[#allocation18_spill]] %s5431_s7 }
   0x9   :  { %5482 = sst [smem:[#allocation19_spill]] %s5432_s8 }
   0xa   :  { %5483 = sst [smem:[#allocation20_spill]] %s5433_s9 }
   0xb   :  { %5484 = sst [smem:[#allocation21_spill]] %s5434_s10 }
   0xc   :  { %5485 = sst [smem:[#allocation22_spill]] %s5435_s11 }
   0xd   :  { %31 = vsyncpa [#allocation3], 0 }
   0xe   :  { %33 = vsyncpa [#allocation3 + $0x1], 0  ;;  %s4756_s27 = smov 0   ;;  %s4758_s3 = smov 0  }
   0xf   :  { %s4760_s7 = smov 0   ;;  %s4762_s28 = smov 0  }
  0x10 LB: > { %5486 = sst [smem:[#allocation5_spill]] %s4595_s27  ;;  %s4777_s8 = sadd.s32 4294967295, %s4607_s28   ;;  %s4607_s28 = sphi %s4762_s28, %s5517_s28   ;;  %s4603_s7 = sphi %s4760_s7, %s5519_s7   ;;  %s4599_s3 = sphi %s4758_s3, %s5521_s3   ;;  %s4595_s27 = sphi %s4756_s27, %s5520_s27  }
  0x11   : > { %5487 = sst [smem:[#allocation6_spill]] %s4603_s7  ;;  %s4132_s4 = sadd.s32 4294967294, %s4607_s28  }
  0x12   : > { %5488 = sst [smem:[#allocation7_spill]] %s4607_s28  ;;  %s4781_s29 = sadd.s32 1, %s4607_s28  }
  0x13   : > { %5489 = sst [smem:[#allocation8_spill]] %s4781_s29  ;;  %s602_s0 = sadd.s32 1, %s4603_s7 }
  0x14   : > { %s599_s9 = ssub.s32 %s4607_s28, %s4781_s29  ;;  %p612_p0 = scmp.ne.s32.totalorder %s4603_s7, %s4599_s3 }
  0x15   : > { %p600_p1 = scmp.eq.s32.totalorder %s599_s9, 0  ;;  %p613_p2 = scmp.eq.s32.totalorder %s4777_s8, 1 }
  0x16   : > { %p618_p3 = scmp.ne.s32.totalorder %s4599_s3, %s4595_s27  ;;  %p619_p4 = scmp.eq.s32.totalorder %s4132_s4, 1 }
  0x17   : > { %s4792_s30 = scalar_select %p600_p1, %s4603_s7, %s602_s0  }
  0x18   : > { %p4794_p5 = por %p613_p2, %p612_p0  ;;  %p4798_p6 = por %p619_p4, %p618_p3 }
  0x19   : > { %5490 = sst [smem:[#allocation9_spill]] %s4792_s30  ;;  %p4135_p7 = scmp.ge.s32.totalorder %s4607_s28, 1 }
  0x1a   : > { %s5492_s5 = scalar_select %p4798_p6, 1, 0 }
  0x1b   : > { %p723_p8 = scmp.lt.s32.totalorder %s4607_s28, 3 }
  0x1c   : > { %5493 = sst [smem:[#allocation10_spill]] %s5492_s5 }
  0x1d   : > { %p724_p9 = pnand %p4135_p7, %p723_p8 }
  0x1e   : > { %p796_p10 = scmp.lt.s32.totalorder (!%p724_p9), %s4777_s8, 1  ;;  %s5494_s0 = sld [smem:[#allocation11_spill]] (!%p724_p9) }
  0x1f   : > { %727 = sbr.rel (%p724_p9) target bundleno = 4185 (0x1059), region = 124  ;;  %s5495_s29 = sld [smem:[#allocation17_spill]] (!%p724_p9) }
  0x20   : > { %s5497_s7 = sld [smem:[#allocation16_spill]] (!%p724_p9)  ;;  %s5471_s1 = smov (!%p724_p9), 120  }
  0x21   : > { %s5498_s5 = sld [smem:[#allocation19_spill]] (!%p724_p9)  ;;  %s5464_s27 = smov (!%p724_p9), 16  }
  0x22   : > { %s5500_s30 = sld [smem:[#allocation18_spill]] (!%p724_p9) }
  0x23   : > { %s5501_s28 = sld [smem:[#allocation13_spill]] (!%p724_p9) }
  0x24   : > { %s4806_s10 = scalar_select %p796_p10, %s4777_s8, 1  ;;  %vm810_vm0 = vcmask 261120   ;;  %v4609_v8 = vmov 0.0   ;;  %vm4610_vm1 = vmmov 0   ;;  %v4614_v34 = vmov 1983009808  }
  0x25   : > { %v842_v7 = vld [vmem:[%s5495_s29 + $0x18] sm:$0xff]  ;;  %4281 = vmatprep.subr.mxu1 %v4609_v8  ;;  %v841_v9 = vld [vmem:[%s5495_s29 + $0x10] sm:$0xff]  ;;  %4289 = vmatprep.mubr.msk.f32.mxu1 %vm4610_vm1, %v4609_v8  ;;  %v840_v10 = vld [vmem:[%s5495_s29 + $0x8] sm:$0xff]  ;;  %v1023_v35 = vunpack.c.l.s4 %v4614_v34  ;;  %v1025_v36 = vlaneseq  ;;  %v4615_v37 = vmov 1934713408   ;;  %vm1450_vm2 = vcmask 64512  }
  0x26   : > { %s5457_s6 = sshll.u32 %s4806_s10, 3  ;;  %4282 = vmatpush3.msra.mxu1 %v842_v7  ;;  %4303 = vmatprep.subr.mxu0 %v4609_v8  ;;  %v839_v11 = vld [vmem:[%s5495_s29] sm:$0xff]  ;;  %s5469_s29 = smov 112   ;;  %v1055_v38 = vunpack.c.l.s4 %v4615_v37  ;;  %vm2240_vm3 = vcmask 130048   ;;  %vm2242_vm4 = vcmask 195584   ;;  %vm3971_vm5 = vcmask 523264  }
  0x27   : > { %s799_s9 = scalar_lea.vmem %s5494_s0, %s5457_s6  ;;  %4283 = vmatprep.subr.mxu1 %v4609_v8  ;;  %4305 = vmatprep.mubr.msk.f32.mxu0 %vm4610_vm1, %v4609_v8  ;;  %s5496_s0 = sld [smem:[#allocation15_spill]]  ;;  %v4140_v18 = vld [vmem:[%s5497_s7] ss:$0 sm:$0xff]  ;;  %v847_v21 = vld [vmem:[%s5498_s5 + $0x18] sm:$0xff]  ;;  %v846_v22 = vld [vmem:[%s5498_s5 + $0x10] sm:$0xff]  ;;  %v1024_v39 = vunpack.c.0.s8 %v1023_v35  ;;  %v1026_v40 = vshrl.u32 %v1025_v36, 7 }
  0x28   : > { %v4814_v0 = vld [vmem:[%s799_s9] sm:$0xff]  ;;  %4284 = vmatpush3.msra.mxu1 %v841_v9  ;;  %v845_v23 = vld [vmem:[%s5498_s5 + $0x8] sm:$0xff]  ;;  %s5467_s6 = smov 104   ;;  %v1056_v43 = vunpack.c.0.s8 %v1055_v38  ;;  %s5462_s9 = smov 24  }
  0x29   : > { %v811_v1 = vsel %vm810_vm0, %v4814_v0, 0.0  ;;  %4285 = vmatprep.subr.mxu1 %v4609_v8  ;;  %v844_v24 = vld [vmem:[%s5498_s5] sm:$0xff]  ;;  %v4891_v44 = vsub.s32 %v1024_v39, %v1026_v40  ;;  %s5503_s11 = sld [smem:[#allocation22_spill]]  ;;  %s5504_s7 = sshll.u32 %s4806_s10, 3 }
  0x2a   : > { %812 = vadd.xlane.f32.xlu0 %v811_v1  ;;  %4286 = vmatpush3.msra.mxu1 %v840_v10  ;;  %v4141_v30 = vld [vmem:[%s5500_s30] ss:$0 sm:$0xff]  ;;  %v4903_v50 = vsub.s32 %v1056_v43, %v1026_v40  ;;  %s5502_s30 = sld [smem:[#allocation21_spill]] }
  0x2b   : > { %4287 = vmatprep.subr.mxu1 %v4609_v8  ;;  %s5509_s4 = sld [smem:[#allocation14_spill]] }
  0x2c   : > { %4288 = vmatpush3.msra.mxu1 %v839_v11 }
  0x2d   : > { %4292 = vmatprep.subr.mxu1 %v4609_v8  ;;  %v4139_v16 = vld [vmem:[%s5496_s0] ss:$0 sm:$0xff]  ;;  %s5499_s0 = sld [smem:[#allocation20_spill]] }
  0x33   : > { %v4143_v27 = vld [vmem:[%s5499_s0] ss:$0 sm:$0xff]  ;;  %s5465_s0 = smov 96  }
  0xb3   : > { %v813_v2 = vpop.xlane.xlu0 %812 }
  0xb4   : > { %v815_v3 = vmul.f32 0.03125, %v813_v2 }
  0xb6   : > { %v816_v4 = vsub.f32 %v4814_v0, %v815_v3 }
  0xb8   : > { %v817_v5 = vmul.f32 %v816_v4, %v816_v4 }
  0xba   : > { %v818_v6 = vsel %vm810_vm0, %v817_v5, 0.0 }
  0xbb   : > { %819 = vadd.xlane.f32.xlu0 %v818_v6 }
 0x144   : > { %v820_v12 = vpop.xlane.xlu0 %819 }
 0x145   : > { %v821_v13 = vmul.f32 0.03125, %v820_v12 }
 0x147   : > { %v822_v14 = vadd.f32 1e-06, %v821_v13 }
 0x149   : > { %4507 = vrsqrt.f32 %v822_v14 }
 0x156   : > { %v4508_v15 = vpop.eup %4507 }
 0x157   : > { %v824_v17 = vmul.f32 %v4508_v15, %v816_v4 }
 0x159   : > { %v831_v19 = vmul.f32 %v4139_v16, %v824_v17 }
 0x15b   : > { %v838_v20 = vadd.f32 %v4140_v18, %v831_v19 }
 0x15d   : > { %4290 = vmatmul.mubr.msk.f32.vlgmr.msra.gmra.mxu1 %vm810_vm0, %v838_v20 }
 0x15e   : > { %4293 = vmatpush3.msra.mxu1 %v847_v21  ;;  %4300 = vmatprep.mubr.msk.f32.mxu1 %vm4610_vm1, %v4609_v8 }
 0x15f   : > { %4294 = vmatprep.subr.mxu1 %v4609_v8 }
 0x160   : > { %4295 = vmatpush3.msra.mxu1 %v846_v22 }
 0x161   : > { %4296 = vmatprep.subr.mxu1 %v4609_v8 }
 0x162   : > { %4297 = vmatpush3.msra.mxu1 %v845_v23 }
 0x163   : > { %4298 = vmatprep.subr.mxu1 %v4609_v8 }
 0x164   : > { %4299 = vmatpush3.msra.mxu1 %v844_v24 }
 0x165   : > { %4301 = vmatmul.mubr.msk.f32.vlgmr.msra.gmra.mxu1 %vm810_vm0, %v838_v20  ;;  %4308 = vmatprep.subr.mxu1 %v4609_v8 }
 0x166   : > { %4310 = vmatprep.mubr.msk.f32.mxu1 %vm4610_vm1, %v4609_v8 }
 0x21d   : > { %v929_v25 = vpop.f32.mrf.mxu1 }
 0x21e   : > { %v930_v32 = vadd.f32 %v4141_v30, %v929_v25 }
 0x21f   : > { %v4291_v26 = vpop.f32.mrf.mxu1 }
 0x220   : > { %v933_v33 = vmul.f32 0.17677669, %v930_v32 }
 0x225   : > { %v1006_v28 = vpop.f32.mrf.mxu1 }
 0x226   : > { %v4873_v29 = vadd.f32 %v4143_v27, %v1006_v28 }
 0x227   : > { %v4302_v31 = vpop.f32.mrf.mxu1 }
 0x228   : > { %1163 = vrot.lane.b32.xlu0 %v4873_v29, %s5467_s6  ;;  %1157 = vrot.lane.b32.xlu1 %v4873_v29, %s5471_s1 }
 0x22c   : > { %1160 = vrot.lane.b32.xlu1 %v4873_v29, %s5469_s29 }
 0x230   : > { %1011 = vrot.lane.b32.xlu1 %v933_v33, %s5471_s1 }
 0x234   : > { %1014 = vrot.lane.b32.xlu1 %v933_v33, %s5469_s29  ;;  %s5505_s29 = sld [smem:[#allocation12_spill]] }
 0x238   : > { %1017 = vrot.lane.b32.xlu1 %v933_v33, %s5467_s6 }
 0x23a   : > { %s803_s1 = scalar_lea.vmem %s5505_s29, %s5504_s7  ;;  %s5512_s7 = smov 8  }
 0x29a   : > { %v4887_v41 = vpop.permute.xlu0 %1163  ;;  %v4889_v42 = vpop.permute.xlu1 %1157 }
 0x29b   : > { %v1182_v45 = vcombine.low %v4889_v42, %v4887_v41  ;;  %v1183_v46 = vcombine.high %v4889_v42, %v4887_v41 }
 0x29d   : > { %v1190_v51 = vrot.slane %v1182_v45, %v4891_v44  ;;  %v1197_v52 = vrot.slane %v1183_v46, %v4891_v44 }
 0x29e   : > { %v4897_v47 = vpop.permute.xlu1 %1160 }
 0x29f   : > { %v1166_v48 = vcombine.low %v4873_v29, %v4897_v47  ;;  %v1167_v49 = vcombine.high %v4873_v29, %v4897_v47 }
 0x2a1   : > { %v1174_v53 = vrot.slane %v1166_v48, %v4891_v44  ;;  %v1181_v54 = vrot.slane %v1167_v49, %v4891_v44 }
 0x2a2   : > { %v1012_v55 = vpop.permute.xlu1 %1011 }
 0x2a3   : > { %v1198_v56 = vcombine.low %v1174_v53, %v1190_v51  ;;  %v1199_v57 = vcombine.high %v1174_v53, %v1190_v51  ;;  %v1214_v58 = vcombine.low %v1181_v54, %v1197_v52  ;;  %v1215_v59 = vcombine.high %v1181_v54, %v1197_v52 }
 0x2a5   : > { %v1206_v60 = vrot.slane %v1198_v56, %v4903_v50  ;;  %v1213_v61 = vrot.slane %v1199_v57, %v4903_v50  ;;  %v1222_v62 = vrot.slane %v1214_v58, %v4903_v50  ;;  %v1229_v63 = vrot.slane %v1215_v59, %v4903_v50 }
 0x2a6   : > { %v1015_v1 = vpop.permute.xlu1 %1014 }
 0x2a7   : > { %v1234_v2 = vcombine.low %v1206_v60, %v1213_v61  ;;  %v4147_v3 = vcombine.high %v1206_v60, %v1213_v61  ;;  %v1250_v4 = vcombine.low %v1222_v62, %v1229_v63  ;;  %v4148_v5 = vcombine.high %v1222_v62, %v1229_v63 }
 0x2a8   : > { %v1020_v6 = vcombine.low %v933_v33, %v1015_v1  ;;  %v1021_v7 = vcombine.high %v933_v33, %v1015_v1 }
 0x2a9   : > { %v1241_v9 = vrot.slane %v1234_v2, %v4891_v44  ;;  %v1249_v10 = vrot.slane %v4147_v3, %v4891_v44  ;;  %v1257_v11 = vrot.slane %v1250_v4, %v4891_v44  ;;  %v1265_v12 = vrot.slane %v4148_v5, %v4891_v44  ;;  %v806_v3 = vld [vmem:[%s5501_s28] sm:$0xff]  ;;  %s5463_s28 = smov 8  }
 0x2aa   : > { %v1018_v13 = vpop.permute.xlu1 %1017  ;;  %v1028_v17 = vrot.slane %v1020_v6, %v4891_v44  ;;  %v1035_v19 = vrot.slane %v1021_v7, %v4891_v44 }
 0x2ab   : > { %v1036_v14 = vcombine.low %v1012_v55, %v1018_v13  ;;  %v1037_v15 = vcombine.high %v1012_v55, %v1018_v13  ;;  %v1266_v16 = vcombine.low %v1241_v9, %v1249_v10  ;;  %v1282_v18 = vcombine.low %v1257_v11, %v1265_v12 }
 0x2ac   : > { %v1267_v39 = vcombine.high %v1241_v9, %v1249_v10  ;;  %v1283_v40 = vcombine.high %v1257_v11, %v1265_v12 }
 0x2ad   : > { %v1044_v20 = vrot.slane %v1036_v14, %v4891_v44  ;;  %v1051_v21 = vrot.slane %v1037_v15, %v4891_v44  ;;  %v1274_v22 = vrot.slane %v1266_v16, %v4903_v50  ;;  %v1290_v23 = vrot.slane %v1282_v18, %v4903_v50 }
 0x2ae   : > { %v1281_v54 = vrot.slane %v1267_v39, %v4903_v50  ;;  %v1297_v55 = vrot.slane %v1283_v40, %v4903_v50 }
 0x2af   : > { %v1052_v24 = vcombine.low %v1028_v17, %v1044_v20  ;;  %v1053_v25 = vcombine.high %v1028_v17, %v1044_v20  ;;  %v1068_v26 = vcombine.low %v1035_v19, %v1051_v21  ;;  %v1069_v27 = vcombine.high %v1035_v19, %v1051_v21 }
 0x2b0   : > { %v1298_v28 = vcombine.low %v1274_v22, %v1290_v23  ;;  %v1299_v30 = vcombine.high %v1274_v22, %v1290_v23  ;;  %v1300_v62 = vcombine.low %v1281_v54, %v1297_v55  ;;  %v1301_v63 = vcombine.high %v1281_v54, %v1297_v55 }
 0x2b1   : > { %v1060_v31 = vrot.slane %v1052_v24, %v4903_v50  ;;  %v1067_v32 = vrot.slane %v1053_v25, %v4903_v50  ;;  %v1076_v33 = vrot.slane %v1068_v26, %v4903_v50  ;;  %v1083_v34 = vrot.slane %v1069_v27, %v4903_v50 }
 0x2b2   : > { %4304 = vmatpush3.xpose.msk.msra.mxu0 %vm1450_vm2, %v1298_v28  ;;  %4309 = vmatpush3.xpose.msk.msra.mxu1 %vm1450_vm2, %v1299_v30 }
 0x2b3   : > { %v1088_v35 = vcombine.low %v1060_v31, %v1067_v32  ;;  %v4145_v36 = vcombine.high %v1060_v31, %v1067_v32  ;;  %v1104_v37 = vcombine.low %v1076_v33, %v1083_v34  ;;  %v4146_v38 = vcombine.high %v1076_v33, %v1083_v34  ;;  %4313 = vmatprep.subr.mxu0 %v4609_v8 }
 0x2b4   : > { %4318 = vmatprep.subr.mxu1 %v4609_v8 }
 0x2b5   : > { %v1095_v43 = vrot.slane %v1088_v35, %v4891_v44  ;;  %v1103_v45 = vrot.slane %v4145_v36, %v4891_v44  ;;  %v1111_v46 = vrot.slane %v1104_v37, %v4891_v44  ;;  %v1119_v48 = vrot.slane %v4146_v38, %v4891_v44 }
 0x2b7   : > { %v1121_v49 = vcombine.high %v1095_v43, %v1103_v45  ;;  %v1137_v51 = vcombine.high %v1111_v46, %v1119_v48  ;;  %v1120_v52 = vcombine.low %v1095_v43, %v1103_v45  ;;  %v1136_v53 = vcombine.low %v1111_v46, %v1119_v48 }
 0x2b9   : > { %v1128_v56 = vrot.slane %v1120_v52, %v4903_v50  ;;  %v1144_v57 = vrot.slane %v1136_v53, %v4903_v50  ;;  %v1135_v60 = vrot.slane %v1121_v49, %v4903_v50  ;;  %v1151_v61 = vrot.slane %v1137_v51, %v4903_v50 }
 0x2bb   : > { %v1152_v58 = vcombine.low %v1128_v56, %v1144_v57  ;;  %v1153_v59 = vcombine.high %v1128_v56, %v1144_v57  ;;  %v1154_v1 = vcombine.low %v1135_v60, %v1151_v61  ;;  %v1155_v2 = vcombine.high %v1135_v60, %v1151_v61 }
 0x2bd   : > { %4306 = vmatmul.mubr.msk.f32.vlgmr.msra.gmra.mxu0 %vm1450_vm2, %v1152_v58  ;;  %4311 = vmatmul.mubr.msk.f32.vlgmr.msra.gmra.mxu1 %vm1450_vm2, %v1153_v59 }
 0x2be   : > { %4314 = vmatpush3.xpose.msk.msra.mxu0 %vm1450_vm2, %v1300_v62  ;;  %4319 = vmatpush3.xpose.msk.msra.mxu1 %vm1450_vm2, %v1301_v63 }
 0x2bf   : > { %4315 = vmatprep.mubr.msk.f32.mxu0 %vm4610_vm1, %v4609_v8  ;;  %4320 = vmatprep.mubr.msk.f32.mxu1 %vm4610_vm1, %v4609_v8 }
 0x2c0   : > { %4323 = vmatprep.subr.mxu0 %v4609_v8  ;;  %4328 = vmatprep.subr.mxu1 %v4609_v8 }
 0x2c1   : > { %4316 = vmatmul.mubr.msk.f32.vlgmr.msra.gmra.mxu0 %vm1450_vm2, %v1154_v1  ;;  %4321 = vmatmul.mubr.msk.f32.vlgmr.msra.gmra.mxu1 %vm1450_vm2, %v1155_v2 }
 0x2c2   : > { %4325 = vmatprep.mubr.msk.f32.mxu0 %vm4610_vm1, %v4609_v8  ;;  %4330 = vmatprep.mubr.msk.f32.mxu1 %vm4610_vm1, %v4609_v8 }
 0x37d   : > { %v1523_v4 = vpop.f32.mrf.mxu0  ;;  %v1599_v5 = vpop.f32.mrf.mxu1 }
 0x37e   : > { %v1524_v6 = vadd.f32 %v1523_v4, %v806_v3  ;;  %v1600_v7 = vadd.f32 %v1599_v5, %v806_v3 }
 0x37f   : > { %v4307_v9 = vpop.f32.mrf.mxu0  ;;  %v4312_v10 = vpop.f32.mrf.mxu1 }
 0x380   : > { %v1755_v11 = vsel %vm1450_vm2, %v1524_v6, -inf  ;;  %v1758_v12 = vsel %vm1450_vm2, %v1600_v7, -inf }
 0x381   : > { %1756 = vmax.xlane.f32.xlu1 %v1755_v11  ;;  %v1675_v13 = vpop.f32.mrf.mxu0  ;;  %1759 = vmax.xlane.f32.xlu0 %v1758_v12  ;;  %v1751_v14 = vpop.f32.mrf.mxu1 }
 0x382   : > { %v1676_v15 = vadd.f32 %v1675_v13, %v806_v3  ;;  %v1752_v18 = vadd.f32 %v1751_v14, %v806_v3 }
 0x383   : > { %v4317_v16 = vpop.f32.mrf.mxu0  ;;  %v4322_v17 = vpop.f32.mrf.mxu1 }
 0x384   : > { %v1761_v19 = vsel %vm1450_vm2, %v1676_v15, -inf  ;;  %v1764_v20 = vsel %vm1450_vm2, %v1752_v18, -inf }
 0x385   : > { %1762 = vmax.xlane.f32.xlu1 %v1761_v19 }
 0x389   : > { %1765 = vmax.xlane.f32.xlu1 %v1764_v20 }
 0x397   : > { %1302 = vrot.lane.b32.xlu0 %v4873_v29, %s5465_s0 }
 0x39a   : > { %1304 = vrot.lane.b32.xlu1 %v4889_v42, %s5465_s0 }
 0x40a   : > { %v1757_v21 = vpop.xlane.xlu1 %1756  ;;  %v1760_v22 = vpop.xlane.xlu0 %1759 }
 0x40b   : > { %v1767_v23 = vsub.f32 %v1524_v6, %v1757_v21  ;;  %v1768_v24 = vsub.f32 %v1600_v7, %v1760_v22 }
 0x40d   : > { %v1771_v25 = vmul.f32 1.442695, %v1767_v23  ;;  %v1773_v26 = vmul.f32 1.442695, %v1768_v24 }
 0x40e   : > { %v1763_v27 = vpop.xlane.xlu1 %1762  ;;  %v1303_v40 = vpop.permute.xlu0 %1302 }
 0x40f   : > { %4509 = vpow2.f32 %v1771_v25  ;;  %v1769_v28 = vsub.f32 %v1676_v15, %v1763_v27 }
 0x410   : > { %4511 = vpow2.f32 %v1773_v26 }
 0x411   : > { %v1775_v30 = vmul.f32 1.442695, %v1769_v28 }
 0x412   : > { %v1766_v31 = vpop.xlane.xlu1 %1765 }
 0x413   : > { %4513 = vpow2.f32 %v1775_v30  ;;  %v1770_v32 = vsub.f32 %v1752_v18, %v1766_v31 }
 0x415   : > { %v1777_v33 = vmul.f32 1.442695, %v1770_v32 }
 0x416   : > { %v1305_v43 = vpop.permute.xlu1 %1304 }
 0x417   : > { %4515 = vpow2.f32 %v1777_v33 }
 0x41c   : > { %v4968_v29 = vpop.eup %4509 }
 0x41d   : > { %v4970_v34 = vpop.eup %4511  ;;  %v1779_v42 = vsel %vm1450_vm2, %v4968_v29, 0.0 }
 0x41e   : > { %1780 = vadd.xlane.f32.xlu0 %v1779_v42  ;;  %v1782_v35 = vsel %vm1450_vm2, %v4970_v34, 0.0 }
 0x41f   : > { %1783 = vadd.xlane.f32.xlu1 %v1782_v35 }
 0x420   : > { %v4976_v36 = vpop.eup %4513 }
 0x421   : > { %v1785_v37 = vsel %vm1450_vm2, %v4976_v36, 0.0 }
 0x422   : > { %1786 = vadd.xlane.f32.xlu0 %v1785_v37 }
 0x424   : > { %v4980_v38 = vpop.eup %4515 }
 0x425   : > { %v1788_v39 = vsel %vm1450_vm2, %v4980_v38, 0.0 }
 0x426   : > { %1789 = vadd.xlane.f32.xlu1 %v1788_v39 }
 0x437   : > { %1306 = vrot.lane.b32.xlu1 %v4897_v47, %s5465_s0 }
 0x438   : > { %1308 = vrot.lane.b32.xlu0 %v4887_v41, %s5465_s0  ;;  %s793_s0 = sand.u32 1, %s4599_s3  }
 0x4a7   : > { %v1781_v45 = vpop.xlane.xlu0 %1780 }
 0x4a8   : > { %v1784_v46 = vpop.xlane.xlu1 %1783  ;;  %4517 = vrcp.f32 %v1781_v45 }
 0x4a9   : > { %4519 = vrcp.f32 %v1784_v46 }
 0x4ab   : > { %v1787_v48 = vpop.xlane.xlu0 %1786 }
 0x4ac   : > { %4521 = vrcp.f32 %v1787_v48 }
 0x4af   : > { %v1309_v49 = vpop.permute.xlu0 %1308  ;;  %v1790_v51 = vpop.xlane.xlu1 %1789 }
 0x4b0   : > { %v1330_v52 = vcombine.low %v1305_v43, %v1309_v49  ;;  %v1331_v53 = vcombine.high %v1305_v43, %v1309_v49  ;;  %4523 = vrcp.f32 %v1790_v51 }
 0x4b2   : > { %v1338_v57 = vrot.slane %v1330_v52, %v4891_v44  ;;  %v1345_v47 = vrot.slane %v1331_v53, %v4891_v44 }
 0x4b3   : > { %v1307_v54 = vpop.permute.xlu1 %1306 }
 0x4b4   : > { %v1314_v55 = vcombine.low %v1303_v40, %v1307_v54  ;;  %v1315_v56 = vcombine.high %v1303_v40, %v1307_v54 }
 0x4b5   : > { %v4518_v17 = vpop.eup %4517 }
 0x4b6   : > { %v1322_v41 = vrot.slane %v1314_v55, %v4891_v44  ;;  %v1329_v58 = vrot.slane %v1315_v56, %v4891_v44  ;;  %v4520_v18 = vpop.eup %4519  ;;  %v1792_v26 = vmul.f32 %v4518_v17, %v4968_v29  ;;  %v852_v29 = vld [vmem:[%s5502_s30 + $0x18] sm:$0xff] }
 0x4b7   : > { %v1794_v27 = vmul.f32 %v4520_v18, %v4970_v34 }
 0x4b8   : > { %v1346_v59 = vcombine.low %v1322_v41, %v1338_v57  ;;  %v1347_v60 = vcombine.high %v1322_v41, %v1338_v57  ;;  %v1362_v61 = vcombine.low %v1329_v58, %v1345_v47  ;;  %v1363_v62 = vcombine.high %v1329_v58, %v1345_v47  ;;  %v851_v47 = vld [vmem:[%s5502_s30 + $0x10] sm:$0xff]  ;;  %v850_v41 = vld [vmem:[%s5502_s30 + $0x8] sm:$0xff] }
 0x4b9   : > { %v4522_v23 = vpop.eup %4521 }
 0x4ba   : > { %v1354_v63 = vrot.slane %v1346_v59, %v4903_v50  ;;  %v1361_v1 = vrot.slane %v1347_v60, %v4903_v50  ;;  %v1370_v2 = vrot.slane %v1362_v61, %v4903_v50  ;;  %v1377_v3 = vrot.slane %v1363_v62, %v4903_v50 }
 0x4bb   : > { %v1796_v32 = vmul.f32 %v4522_v23, %v4976_v36 }
 0x4bc   : > { %v1382_v4 = vcombine.low %v1354_v63, %v1361_v1  ;;  %v4149_v5 = vcombine.high %v1354_v63, %v1361_v1  ;;  %v1398_v6 = vcombine.low %v1370_v2, %v1377_v3  ;;  %v4150_v7 = vcombine.high %v1370_v2, %v1377_v3  ;;  %v849_v3 = vld [vmem:[%s5502_s30] sm:$0xff] }
 0x4bd   : > { %v4524_v28 = vpop.eup %4523 }
 0x4be   : > { %v1389_v9 = vrot.slane %v1382_v4, %v4891_v44  ;;  %v1397_v10 = vrot.slane %v4149_v5, %v4891_v44  ;;  %v1405_v11 = vrot.slane %v1398_v6, %v4891_v44  ;;  %v1413_v12 = vrot.slane %v4150_v7, %v4891_v44 }
 0x4bf   : > { %v1798_v33 = vmul.f32 %v4524_v28, %v4980_v38 }
 0x4c0   : > { %v1414_v13 = vcombine.low %v1389_v9, %v1397_v10  ;;  %v1430_v14 = vcombine.low %v1405_v11, %v1413_v12  ;;  %v1415_v15 = vcombine.high %v1389_v9, %v1397_v10  ;;  %v1431_v16 = vcombine.high %v1405_v11, %v1413_v12 }
 0x4c2   : > { %v1422_v19 = vrot.slane %v1414_v13, %v4903_v50  ;;  %v1438_v20 = vrot.slane %v1430_v14, %v4903_v50  ;;  %v1429_v21 = vrot.slane %v1415_v15, %v4903_v50  ;;  %v1445_v22 = vrot.slane %v1431_v16, %v4903_v50 }
 0x4c4   : > { %v1446_v24 = vcombine.low %v1422_v19, %v1438_v20  ;;  %v1447_v25 = vcombine.high %v1422_v19, %v1438_v20  ;;  %v1448_v30 = vcombine.low %v1429_v21, %v1445_v22  ;;  %v1449_v31 = vcombine.high %v1429_v21, %v1445_v22 }
 0x4c6   : > { %4324 = vmatpush3.msra.mxu0 %v1446_v24  ;;  %4329 = vmatpush3.msra.mxu1 %v1447_v25 }
 0x4c7   : > { %4326 = vmatmul.mubr.msk.f32.vlgmr.msra.gmra.mxu0 %vm1450_vm2, %v1792_v26  ;;  %4331 = vmatmul.mubr.msk.f32.vlgmr.msra.gmra.mxu1 %vm1450_vm2, %v1794_v27  ;;  %v4165_v27 = vld [vmem:[%s5503_s11] ss:$0 sm:$0xff]  ;;  %s5508_s11 = smov 104  }
 0x4c8   : > { %4333 = vmatprep.subr.mxu0 %v4609_v8  ;;  %4338 = vmatprep.subr.mxu1 %v4609_v8 }
 0x4c9   : > { %4334 = vmatpush3.msra.mxu0 %v1448_v30  ;;  %4339 = vmatpush3.msra.mxu1 %v1449_v31 }
 0x4ca   : > { %4335 = vmatprep.mubr.msk.f32.mxu0 %vm4610_vm1, %v4609_v8  ;;  %4340 = vmatprep.mubr.msk.f32.mxu1 %vm4610_vm1, %v4609_v8 }
 0x4cb   : > { %4336 = vmatmul.mubr.msk.f32.vlgmr.msra.gmra.mxu0 %vm1450_vm2, %v1796_v32  ;;  %4341 = vmatmul.mubr.msk.f32.vlgmr.msra.gmra.mxu1 %vm1450_vm2, %v1798_v33 }
 0x4cc   : > { %4343 = vmatprep.subr.mxu0 %v4609_v8  ;;  %4351 = vmatprep.mubr.msk.f32.mxu0 %vm4610_vm1, %v4609_v8 }
 0x4cd   : > { %4354 = vmatprep.subr.mxu1 %v4609_v8  ;;  %4362 = vmatprep.mubr.msk.f32.mxu1 %vm4610_vm1, %v4609_v8 }
 0x4ce   : > { %4344 = vmatpush3.msra.mxu0 %v852_v29  ;;  %v2361_v29 = vld [vmem:[%s5440_s16 + $0x18] sm:$0xff] }
 0x4cf   : > { %4345 = vmatprep.subr.mxu0 %v4609_v8 }
 0x4d0   : > { %4346 = vmatpush3.msra.mxu0 %v851_v47  ;;  %v4167_v47 = vld [vmem:[%s5436_s12] ss:$0 sm:$0xff] }
 0x4d1   : > { %4347 = vmatprep.subr.mxu0 %v4609_v8 }
 0x4d2   : > { %4348 = vmatpush3.msra.mxu0 %v850_v41 }
 0x4d3   : > { %4349 = vmatprep.subr.mxu0 %v4609_v8 }
 0x4d4   : > { %4350 = vmatpush3.msra.mxu0 %v849_v3 }
 0x4d5   : > { %4365 = vmatprep.subr.mxu0 %v4609_v8 }
 0x587   : > { %v1868_v34 = vpop.f32.mrf.mxu0  ;;  %v1941_v42 = vpop.f32.mrf.mxu1 }
 0x589   : > { %v4327_v35 = vpop.f32.mrf.mxu0  ;;  %v4332_v36 = vpop.f32.mrf.mxu1 }
 0x58a   : > { %v805_v35 = vld [vmem:[%s803_s1] sm:$0xff]  ;;  %s4048_s1 = scalar_lea.sflag [#allocation3], %s793_s0 }
 0x58b   : > { %v2014_v37 = vpop.f32.mrf.mxu0  ;;  %v2087_v38 = vpop.f32.mrf.mxu1 }
 0x58c   : > { %v2091_v39 = vcombine.low %v1868_v34, %v2014_v37  ;;  %v2092_v40 = vcombine.high %v1868_v34, %v2014_v37  ;;  %v2107_v43 = vcombine.low %v1941_v42, %v2087_v38  ;;  %v2108_v45 = vcombine.high %v1941_v42, %v2087_v38  ;;  %v2360_v34 = vld [vmem:[%s5440_s16 + $0x10] sm:$0xff]  ;;  %v2358_v42 = vld [vmem:[%s5440_s16] sm:$0xff] }
 0x58d   : > { %v4337_v46 = vpop.f32.mrf.mxu0  ;;  %v4342_v48 = vpop.f32.mrf.mxu1 }
 0x58e   : > { %v2099_v49 = vrot.slane %v2091_v39, %v4891_v44  ;;  %v2106_v51 = vrot.slane %v2092_v40, %v4891_v44  ;;  %v2115_v52 = vrot.slane %v2107_v43, %v4891_v44  ;;  %v2122_v53 = vrot.slane %v2108_v45, %v4891_v44  ;;  %v2356_v43 = vld [vmem:[%s5438_s14 + $0x18] sm:$0xff]  ;;  %v2355_v45 = vld [vmem:[%s5438_s14 + $0x10] sm:$0xff]  ;;  %v2354_v46 = vld [vmem:[%s5438_s14 + $0x8] sm:$0xff] }
 0x58f   : > { %4355 = vmatpush3.msra.mxu1 %v2356_v43  ;;  %v2353_v48 = vld [vmem:[%s5438_s14] sm:$0xff] }
 0x590   : > { %v2123_v54 = vcombine.low %v2099_v49, %v2115_v52  ;;  %v2124_v55 = vcombine.high %v2099_v49, %v2115_v52  ;;  %v2139_v56 = vcombine.low %v2106_v51, %v2122_v53  ;;  %v2140_v57 = vcombine.high %v2106_v51, %v2122_v53  ;;  %4356 = vmatprep.subr.mxu1 %v4609_v8  ;;  %v4171_v49 = vld [vmem:[%s5441_s17] ss:$0 sm:$0xff] }
 0x591   : > { %4357 = vmatpush3.msra.mxu1 %v2355_v45 }
 0x592   : > { %v2131_v58 = vrot.slane %v2123_v54, %v4903_v50  ;;  %v2138_v59 = vrot.slane %v2124_v55, %v4903_v50  ;;  %v2147_v60 = vrot.slane %v2139_v56, %v4903_v50  ;;  %v2154_v61 = vrot.slane %v2140_v57, %v4903_v50  ;;  %4358 = vmatprep.subr.mxu1 %v4609_v8 }
 0x593   : > { %4359 = vmatpush3.msra.mxu1 %v2354_v46 }
 0x594   : > { %v2159_v62 = vcombine.low %v2131_v58, %v2138_v59  ;;  %v4163_v63 = vcombine.high %v2131_v58, %v2138_v59  ;;  %v2175_v1 = vcombine.low %v2147_v60, %v2154_v61  ;;  %v4164_v2 = vcombine.high %v2147_v60, %v2154_v61  ;;  %4360 = vmatprep.subr.mxu1 %v4609_v8  ;;  %v4168_v58 = vld [vmem:[%s5437_s13] ss:$0 sm:$0xff] }
 0x595   : > { %4361 = vmatpush3.msra.mxu1 %v2353_v48 }
 0x596   : > { %v2166_v4 = vrot.slane %v2159_v62, %v4891_v44  ;;  %v2174_v5 = vrot.slane %v4163_v63, %v4891_v44  ;;  %v2182_v6 = vrot.slane %v2175_v1, %v4891_v44  ;;  %v2190_v7 = vrot.slane %v4164_v2, %v4891_v44  ;;  %4376 = vmatprep.subr.mxu1 %v4609_v8 }
 0x598   : > { %v2192_v9 = vcombine.high %v2166_v4, %v2174_v5  ;;  %v2208_v10 = vcombine.high %v2182_v6, %v2190_v7  ;;  %v2191_v11 = vcombine.low %v2166_v4, %v2174_v5  ;;  %v2207_v12 = vcombine.low %v2182_v6, %v2190_v7 }
 0x59a   : > { %v2206_v13 = vrot.slane %v2192_v9, %v4903_v50  ;;  %v2222_v14 = vrot.slane %v2208_v10, %v4903_v50  ;;  %v2199_v15 = vrot.slane %v2191_v11, %v4903_v50  ;;  %v2215_v16 = vrot.slane %v2207_v12, %v4903_v50 }
 0x59c   : > { %v2225_v17 = vcombine.low %v2206_v13, %v2222_v14  ;;  %v2224_v18 = vcombine.high %v2199_v15, %v2215_v16  ;;  %v2223_v19 = vcombine.low %v2199_v15, %v2215_v16  ;;  %v2226_v20 = vcombine.high %v2206_v13, %v2222_v14 }
 0x59e   : > { %2232 = vrot.lane.b32.xlu0 %v2225_v17, %s5464_s27  ;;  %2228 = vrot.lane.b32.xlu1 %v2224_v18, %s5463_s28  ;;  %s5506_s28 = smov 120   ;;  %s5511_s27 = smov 16  }
 0x5a2   : > { %2236 = vrot.lane.b32.xlu1 %v2226_v20, %s5462_s9  ;;  %s5507_s9 = smov 112  }
 0x610   : > { %v2229_v21 = vpop.permute.xlu1 %2228  ;;  %v2233_v22 = vpop.permute.xlu0 %2232 }
 0x611   : > { %v2239_v23 = vsel %vm1450_vm2, %v2223_v19, %v2229_v21 }
 0x612   : > { %v2241_v25 = vsel %vm2240_vm3, %v2239_v23, %v2233_v22 }
 0x614   : > { %v2237_v24 = vpop.permute.xlu1 %2236 }
 0x615   : > { %v2243_v26 = vsel %vm2242_vm4, %v2241_v25, %v2237_v24 }
 0x616   : > { %4352 = vmatmul.mubr.msk.f32.vlgmr.msra.gmra.mxu0 %vm810_vm0, %v2243_v26 }
 0x617   : > { %4373 = vmatprep.mubr.msk.f32.mxu0 %vm4610_vm1, %v4609_v8  ;;  %4366 = vmatpush3.msra.mxu0 %v2361_v29 }
 0x618   : > { %4367 = vmatprep.subr.mxu0 %v4609_v8 }
 0x619   : > { %4368 = vmatpush3.msra.mxu0 %v2360_v34 }
 0x61a   : > { %4369 = vmatprep.subr.mxu0 %v4609_v8 }
 0x6d6   : > { %v2319_v28 = vpop.f32.mrf.mxu0 }
 0x6d7   : > { %v2320_v30 = vadd.f32 %v4165_v27, %v2319_v28 }
 0x6d8   : > { %v4353_v31 = vpop.f32.mrf.mxu0 }
 0x6d9   : > { %v5069_v32 = vadd.f32 %v2320_v30, %v4814_v0  ;;  %v2359_v0 = vld [vmem:[%s5440_s16 + $0x8] sm:$0xff] }
 0x6da   : > { %4370 = vmatpush3.msra.mxu0 %v2359_v0 }
 0x6db   : > { %v2326_v33 = vsel %vm810_vm0, %v5069_v32, 0.0  ;;  %4371 = vmatprep.subr.mxu0 %v4609_v8 }
 0x6dc   : > { %2327 = vadd.xlane.f32.xlu0 %v2326_v33  ;;  %4372 = vmatpush3.msra.mxu0 %v2358_v42 }
 0x6dd   : > { %4374 = vmatmul.mubr.msk.f32.vlgmr.msra.gmra.mxu0 %vm810_vm0, %v805_v35  ;;  %4386 = vmatprep.subr.mxu0 %v4609_v8 }
 0x6de   : > { %4388 = vmatprep.mubr.msk.f32.mxu0 %vm4610_vm1, %v4609_v8 }
 0x765   : > { %v2328_v36 = vpop.xlane.xlu0 %2327 }
 0x766   : > { %v2329_v37 = vmul.f32 0.03125, %v2328_v36 }
 0x768   : > { %v2330_v38 = vsub.f32 %v5069_v32, %v2329_v37  ;;  %v4169_v37 = vld [vmem:[%s5439_s15] ss:$0 sm:$0xff] }
 0x76a   : > { %v2331_v39 = vmul.f32 %v2330_v38, %v2330_v38 }
 0x76c   : > { %v2332_v40 = vsel %vm810_vm0, %v2331_v39, 0.0 }
 0x76d   : > { %2333 = vadd.xlane.f32.xlu1 %v2332_v40 }
 0x79d   : > { %v2523_v51 = vpop.f32.mrf.mxu0 }
 0x79e   : > { %v5118_v52 = vadd.f32 %v4171_v49, %v2523_v51 }
 0x79f   : > { %v4375_v53 = vpop.f32.mrf.mxu0 }
 0x7a0   : > { %2674 = vrot.lane.b32.xlu0 %v5118_v52, %s5506_s28  ;;  %2677 = vrot.lane.b32.xlu1 %v5118_v52, %s5507_s9 }
 0x7a4   : > { %2680 = vrot.lane.b32.xlu0 %v5118_v52, %s5508_s11 }
 0x7f6   : > { %v2334_v54 = vpop.xlane.xlu1 %2333 }
 0x7f7   : > { %v2335_v55 = vmul.f32 0.03125, %v2334_v54 }
 0x7f9   : > { %v2336_v56 = vadd.f32 1e-06, %v2335_v55 }
 0x7fb   : > { %4525 = vrsqrt.f32 %v2336_v56 }
 0x808   : > { %v4526_v57 = vpop.eup %4525 }
 0x809   : > { %v2338_v41 = vmul.f32 %v4526_v57, %v2330_v38 }
 0x80b   : > { %v2345_v59 = vmul.f32 %v4167_v47, %v2338_v41 }
 0x80d   : > { %v2352_v60 = vadd.f32 %v4168_v58, %v2345_v59 }
 0x80f   : > { %4363 = vmatmul.mubr.msk.f32.vlgmr.msra.gmra.mxu1 %vm810_vm0, %v2352_v60 }
 0x810   : > { %4378 = vmatprep.mubr.msk.f32.mxu1 %vm4610_vm1, %v4609_v8 }
 0x812   : > { %v5135_v61 = vpop.permute.xlu0 %2674  ;;  %v5137_v62 = vpop.permute.xlu1 %2677 }
 0x813   : > { %v2683_v1 = vcombine.low %v5118_v52, %v5137_v62  ;;  %v2684_v2 = vcombine.high %v5118_v52, %v5137_v62 }
 0x815   : > { %v2691_v5 = vrot.slane %v2683_v1, %v4891_v44  ;;  %v2698_v6 = vrot.slane %v2684_v2, %v4891_v44 }
 0x816   : > { %v5139_v63 = vpop.permute.xlu0 %2680 }
 0x817   : > { %v2699_v3 = vcombine.low %v5135_v61, %v5139_v63  ;;  %v2700_v4 = vcombine.high %v5135_v61, %v5139_v63 }
 0x819   : > { %v2707_v7 = vrot.slane %v2699_v3, %v4891_v44  ;;  %v2714_v9 = vrot.slane %v2700_v4, %v4891_v44 }
 0x81b   : > { %v2715_v10 = vcombine.low %v2691_v5, %v2707_v7  ;;  %v2716_v11 = vcombine.high %v2691_v5, %v2707_v7  ;;  %v2731_v12 = vcombine.low %v2698_v6, %v2714_v9  ;;  %v2732_v13 = vcombine.high %v2698_v6, %v2714_v9 }
 0x81d   : > { %v2723_v14 = vrot.slane %v2715_v10, %v4903_v50  ;;  %v2730_v15 = vrot.slane %v2716_v11, %v4903_v50  ;;  %v2739_v16 = vrot.slane %v2731_v12, %v4903_v50  ;;  %v2746_v17 = vrot.slane %v2732_v13, %v4903_v50 }
 0x81f   : > { %v2751_v18 = vcombine.low %v2723_v14, %v2730_v15  ;;  %v4175_v19 = vcombine.high %v2723_v14, %v2730_v15  ;;  %v2767_v20 = vcombine.low %v2739_v16, %v2746_v17  ;;  %v4176_v21 = vcombine.high %v2739_v16, %v2746_v17 }
 0x821   : > { %v2758_v22 = vrot.slane %v2751_v18, %v4891_v44  ;;  %v2766_v23 = vrot.slane %v4175_v19, %v4891_v44  ;;  %v2774_v24 = vrot.slane %v2767_v20, %v4891_v44  ;;  %v2782_v25 = vrot.slane %v4176_v21, %v4891_v44 }
 0x823   : > { %v2783_v26 = vcombine.low %v2758_v22, %v2766_v23  ;;  %v2784_v27 = vcombine.high %v2758_v22, %v2766_v23  ;;  %v2799_v28 = vcombine.low %v2774_v24, %v2782_v25  ;;  %v2800_v30 = vcombine.high %v2774_v24, %v2782_v25 }
 0x825   : > { %v2791_v31 = vrot.slane %v2783_v26, %v4903_v50  ;;  %v2807_v33 = vrot.slane %v2799_v28, %v4903_v50  ;;  %v5164_v29 = vrot.slane %v2784_v27, %v4903_v50  ;;  %v5167_v34 = vrot.slane %v2800_v30, %v4903_v50  ;;  %v807_v26 = vld [vmem:[%s5509_s4] sm:$0xff]  ;;  %s5513_s4 = smov 24  }
 0x827   : > { %v2815_v0 = vcombine.low %v2791_v31, %v2807_v33  ;;  %v2817_v42 = vcombine.low %v5164_v29, %v5167_v34  ;;  %v2816_v35 = vcombine.high %v2791_v31, %v2807_v33  ;;  %v2818_v36 = vcombine.high %v5164_v29, %v5167_v34 }
 0x829   : > { %4377 = vmatpush3.xpose.msk.msra.mxu1 %vm1450_vm2, %v2815_v0  ;;  %4387 = vmatpush3.xpose.msk.msra.mxu0 %vm1450_vm2, %v2817_v42 }
 0x82a   : > { %4381 = vmatprep.subr.mxu1 %v4609_v8  ;;  %4396 = vmatprep.subr.mxu0 %v4609_v8 }
 0x8cf   : > { %v2443_v38 = vpop.f32.mrf.mxu1 }
 0x8d0   : > { %v2444_v39 = vadd.f32 %v4169_v37, %v2443_v38 }
 0x8d1   : > { %v4364_v40 = vpop.f32.mrf.mxu1 }
 0x8d2   : > { %v2447_v43 = vmul.f32 0.17677669, %v2444_v39 }
 0x8d4   : > { %2531 = vrot.lane.b32.xlu0 %v2447_v43, %s5507_s9  ;;  %2528 = vrot.lane.b32.xlu1 %v2447_v43, %s5506_s28  ;;  %s5510_s28 = smov 96  }
 0x8d8   : > { %2534 = vrot.lane.b32.xlu1 %v2447_v43, %s5508_s11 }
 0x946   : > { %v2532_v45 = vpop.permute.xlu0 %2531  ;;  %v2529_v46 = vpop.permute.xlu1 %2528 }
 0x947   : > { %v2537_v48 = vcombine.low %v2447_v43, %v2532_v45  ;;  %v2538_v49 = vcombine.high %v2447_v43, %v2532_v45 }
 0x949   : > { %v2545_v55 = vrot.slane %v2537_v48, %v4891_v44  ;;  %v2552_v56 = vrot.slane %v2538_v49, %v4891_v44 }
 0x94a   : > { %v2535_v51 = vpop.permute.xlu1 %2534 }
 0x94b   : > { %v2553_v53 = vcombine.low %v2529_v46, %v2535_v51  ;;  %v2554_v54 = vcombine.high %v2529_v46, %v2535_v51 }
 0x94d   : > { %v2561_v57 = vrot.slane %v2553_v53, %v4891_v44  ;;  %v2568_v47 = vrot.slane %v2554_v54, %v4891_v44 }
 0x94f   : > { %v2569_v41 = vcombine.low %v2545_v55, %v2561_v57  ;;  %v2570_v58 = vcombine.high %v2545_v55, %v2561_v57  ;;  %v2585_v59 = vcombine.low %v2552_v56, %v2568_v47  ;;  %v2586_v60 = vcombine.high %v2552_v56, %v2568_v47 }
 0x951   : > { %v2577_v1 = vrot.slane %v2569_v41, %v4903_v50  ;;  %v2584_v2 = vrot.slane %v2570_v58, %v4903_v50  ;;  %v2593_v3 = vrot.slane %v2585_v59, %v4903_v50  ;;  %v2600_v4 = vrot.slane %v2586_v60, %v4903_v50 }
 0x953   : > { %v2605_v5 = vcombine.low %v2577_v1, %v2584_v2  ;;  %v4173_v6 = vcombine.high %v2577_v1, %v2584_v2  ;;  %v2621_v7 = vcombine.low %v2593_v3, %v2600_v4  ;;  %v4174_v9 = vcombine.high %v2593_v3, %v2600_v4 }
 0x955   : > { %v2612_v10 = vrot.slane %v2605_v5, %v4891_v44  ;;  %v2620_v11 = vrot.slane %v4173_v6, %v4891_v44  ;;  %v2628_v12 = vrot.slane %v2621_v7, %v4891_v44  ;;  %v2636_v13 = vrot.slane %v4174_v9, %v4891_v44 }
 0x957   : > { %v2637_v14 = vcombine.low %v2612_v10, %v2620_v11  ;;  %v2638_v15 = vcombine.high %v2612_v10, %v2620_v11  ;;  %v2653_v16 = vcombine.low %v2628_v12, %v2636_v13  ;;  %v2654_v17 = vcombine.high %v2628_v12, %v2636_v13 }
 0x959   : > { %v2645_v18 = vrot.slane %v2637_v14, %v4903_v50  ;;  %v2661_v19 = vrot.slane %v2653_v16, %v4903_v50  ;;  %v2652_v20 = vrot.slane %v2638_v15, %v4903_v50  ;;  %v2668_v21 = vrot.slane %v2654_v17, %v4903_v50 }
 0x95b   : > { %v2669_v22 = vcombine.low %v2645_v18, %v2661_v19  ;;  %v2671_v23 = vcombine.low %v2652_v20, %v2668_v21  ;;  %v2670_v24 = vcombine.high %v2645_v18, %v2661_v19  ;;  %v2672_v25 = vcombine.high %v2652_v20, %v2668_v21 }
 0x95d   : > { %4379 = vmatmul.mubr.msk.f32.vlgmr.msra.gmra.mxu1 %vm1450_vm2, %v2669_v22  ;;  %4389 = vmatmul.mubr.msk.f32.vlgmr.msra.gmra.mxu0 %vm1450_vm2, %v2671_v23 }
 0x95e   : > { %4382 = vmatpush3.xpose.msk.msra.mxu1 %vm1450_vm2, %v2816_v35  ;;  %4383 = vmatprep.mubr.msk.f32.mxu1 %vm4610_vm1, %v4609_v8 }
 0x95f   : > { %4391 = vmatprep.subr.mxu1 %v4609_v8  ;;  %4398 = vmatprep.mubr.msk.f32.mxu0 %vm4610_vm1, %v4609_v8 }
 0x961   : > { %4384 = vmatmul.mubr.msk.f32.vlgmr.msra.gmra.mxu1 %vm1450_vm2, %v2670_v24 }
 0x962   : > { %4392 = vmatpush3.xpose.msk.msra.mxu1 %vm1450_vm2, %v2818_v36  ;;  %4393 = vmatprep.mubr.msk.f32.mxu1 %vm4610_vm1, %v4609_v8 }
 0x963   : > { %4401 = vmatprep.subr.mxu1 %v4609_v8 }
 0x965   : > { %4394 = vmatmul.mubr.msk.f32.vlgmr.msra.gmra.mxu1 %vm1450_vm2, %v2672_v25 }
 0x966   : > { %4403 = vmatprep.mubr.msk.f32.mxu1 %vm4610_vm1, %v4609_v8 }
 0xa1d   : > { %v3039_v27 = vpop.f32.mrf.mxu1  ;;  %v3191_v28 = vpop.f32.mrf.mxu0 }
 0xa1e   : > { %v3040_v30 = vadd.f32 %v3039_v27, %v807_v26  ;;  %v3192_v29 = vadd.f32 %v3191_v28, %v807_v26 }
 0xa1f   : > { %v4380_v31 = vpop.f32.mrf.mxu1  ;;  %v4390_v33 = vpop.f32.mrf.mxu0 }
 0xa20   : > { %v3271_v34 = vsel %vm1450_vm2, %v3040_v30, -inf  ;;  %v3277_v36 = vsel %vm1450_vm2, %v3192_v29, -inf }
 0xa21   : > { %3272 = vmax.xlane.f32.xlu0 %v3271_v34  ;;  %v3115_v0 = vpop.f32.mrf.mxu1 }
 0xa22   : > { %v3116_v42 = vadd.f32 %v3115_v0, %v807_v26 }
 0xa23   : > { %v4385_v35 = vpop.f32.mrf.mxu1 }
 0xa24   : > { %v3274_v37 = vsel %vm1450_vm2, %v3116_v42, -inf }
 0xa25   : > { %3278 = vmax.xlane.f32.xlu0 %v3277_v36  ;;  %3275 = vmax.xlane.f32.xlu1 %v3274_v37  ;;  %v3267_v38 = vpop.f32.mrf.mxu1 }
 0xa26   : > { %v3268_v39 = vadd.f32 %v3267_v38, %v807_v26 }
 0xa27   : > { %v4395_v40 = vpop.f32.mrf.mxu1 }
 0xa28   : > { %v3280_v43 = vsel %vm1450_vm2, %v3268_v39, -inf }
 0xa29   : > { %3281 = vmax.xlane.f32.xlu0 %v3280_v43 }
 0xa36   : > { %2819 = vrot.lane.b32.xlu1 %v5118_v52, %s5510_s28 }
 0xaaa   : > { %v3273_v45 = vpop.xlane.xlu0 %3272 }
 0xaab   : > { %v3283_v46 = vsub.f32 %v3040_v30, %v3273_v45 }
 0xaad   : > { %v3287_v48 = vmul.f32 1.442695, %v3283_v46 }
 0xaae   : > { %v3279_v49 = vpop.xlane.xlu0 %3278  ;;  %v3276_v51 = vpop.xlane.xlu1 %3275 }
 0xaaf   : > { %4527 = vpow2.f32 %v3287_v48  ;;  %v3285_v53 = vsub.f32 %v3192_v29, %v3279_v49  ;;  %v3284_v54 = vsub.f32 %v3116_v42, %v3276_v51 }
 0xab1   : > { %v3291_v55 = vmul.f32 1.442695, %v3285_v53  ;;  %v3289_v56 = vmul.f32 1.442695, %v3284_v54 }
 0xab2   : > { %v3282_v57 = vpop.xlane.xlu0 %3281  ;;  %v2820_v5 = vpop.permute.xlu1 %2819 }
 0xab3   : > { %4529 = vpow2.f32 %v3291_v55  ;;  %v3286_v47 = vsub.f32 %v3268_v39, %v3282_v57 }
 0xab4   : > { %4531 = vpow2.f32 %v3289_v56 }
 0xab5   : > { %v3293_v41 = vmul.f32 1.442695, %v3286_v47 }
 0xab7   : > { %4533 = vpow2.f32 %v3293_v41 }
 0xabc   : > { %v5224_v58 = vpop.eup %4527 }
 0xabd   : > { %v3295_v52 = vsel %vm1450_vm2, %v5224_v58, 0.0 }
 0xabe   : > { %3296 = vadd.xlane.f32.xlu1 %v3295_v52 }
 0xac0   : > { %v5228_v59 = vpop.eup %4529 }
 0xac1   : > { %v4532_v60 = vpop.eup %4531  ;;  %v3301_v1 = vsel %vm1450_vm2, %v5228_v59, 0.0 }
 0xac2   : > { %3302 = vadd.xlane.f32.xlu1 %v3301_v1  ;;  %v3298_v2 = vsel %vm1450_vm2, %v4532_v60, 0.0 }
 0xac3   : > { %3299 = vadd.xlane.f32.xlu0 %v3298_v2 }
 0xac4   : > { %v5233_v3 = vpop.eup %4533 }
 0xac5   : > { %v3304_v4 = vsel %vm1450_vm2, %v5233_v3, 0.0 }
 0xac7   : > { %3305 = vadd.xlane.f32.xlu0 %v3304_v4 }
 0xad3   : > { %2823 = vrot.lane.b32.xlu1 %v5137_v62, %s5510_s28 }
 0xad7   : > { %2825 = vrot.lane.b32.xlu1 %v5139_v63, %s5510_s28 }
 0xadd   : > { %2821 = vrot.lane.b32.xlu0 %v5135_v61, %s5510_s28  ;;  %s4202_s28 = sshll.u32 %s4777_s8, 7  ;;  %s4620_s8 = smov [#allocation2]  }
 0xade   : > { %s4059_s6 = scalar_lea.hbm %s5450_s26, %s4202_s28 }
 0xb47   : > { %v3297_v6 = vpop.xlane.xlu1 %3296 }
 0xb48   : > { %4535 = vrcp.f32 %v3297_v6 }
 0xb4b   : > { %v3303_v7 = vpop.xlane.xlu1 %3302 }
 0xb4c   : > { %v3300_v9 = vpop.xlane.xlu0 %3299 }
 0xb4d   : > { %4537 = vrcp.f32 %v3300_v9 }
 0xb4e   : > { %4539 = vrcp.f32 %v3303_v7 }
 0xb4f   : > { %v2824_v10 = vpop.permute.xlu1 %2823 }
 0xb50   : > { %v3306_v11 = vpop.xlane.xlu0 %3305  ;;  %v2831_v12 = vcombine.low %v2820_v5, %v2824_v10  ;;  %v2832_v13 = vcombine.high %v2820_v5, %v2824_v10 }
 0xb51   : > { %4541 = vrcp.f32 %v3306_v11 }
 0xb52   : > { %v2839_v62 = vrot.slane %v2831_v12, %v4891_v44  ;;  %v2846_v63 = vrot.slane %v2832_v13, %v4891_v44 }
 0xb53   : > { %v2826_v14 = vpop.permute.xlu1 %2825 }
 0xb54   : > { %v2822_v15 = vpop.permute.xlu0 %2821 }
 0xb55   : > { %v2847_v16 = vcombine.low %v2822_v15, %v2826_v14  ;;  %v2848_v17 = vcombine.high %v2822_v15, %v2826_v14  ;;  %v4536_v38 = vpop.eup %4535 }
 0xb56   : > { %v3308_v53 = vmul.f32 %v4536_v38, %v5224_v58  ;;  %v2366_v58 = vld [vmem:[%s5442_s18 + $0x18] sm:$0xff] }
 0xb57   : > { %v2855_v61 = vrot.slane %v2847_v16, %v4891_v44  ;;  %v2862_v18 = vrot.slane %v2848_v17, %v4891_v44 }
 0xb59   : > { %v2863_v19 = vcombine.low %v2839_v62, %v2855_v61  ;;  %v2864_v20 = vcombine.high %v2839_v62, %v2855_v61  ;;  %v2879_v21 = vcombine.low %v2846_v63, %v2862_v18  ;;  %v2880_v22 = vcombine.high %v2846_v63, %v2862_v18  ;;  %v2365_v63 = vld [vmem:[%s5442_s18 + $0x10] sm:$0xff]  ;;  %v2364_v61 = vld [vmem:[%s5442_s18 + $0x8] sm:$0xff] }
 0xb5a   : > { %v4538_v39 = vpop.eup %4537 }
 0xb5b   : > { %v2871_v23 = vrot.slane %v2863_v19, %v4903_v50  ;;  %v2878_v24 = vrot.slane %v2864_v20, %v4903_v50  ;;  %v2887_v25 = vrot.slane %v2879_v21, %v4903_v50  ;;  %v2894_v26 = vrot.slane %v2880_v22, %v4903_v50  ;;  %v4540_v48 = vpop.eup %4539 }
 0xb5c   : > { %v3310_v54 = vmul.f32 %v4538_v39, %v4532_v60  ;;  %v3312_v47 = vmul.f32 %v4540_v48, %v5228_v59 }
 0xb5d   : > { %v2899_v27 = vcombine.low %v2871_v23, %v2878_v24  ;;  %v4177_v28 = vcombine.high %v2871_v23, %v2878_v24  ;;  %v2915_v30 = vcombine.low %v2887_v25, %v2894_v26  ;;  %v4178_v31 = vcombine.high %v2887_v25, %v2894_v26  ;;  %v2363_v26 = vld [vmem:[%s5442_s18] sm:$0xff] }
 0xb5e   : > { %v4542_v55 = vpop.eup %4541 }
 0xb5f   : > { %v2906_v33 = vrot.slane %v2899_v27, %v4891_v44  ;;  %v2914_v29 = vrot.slane %v4177_v28, %v4891_v44  ;;  %v2922_v34 = vrot.slane %v2915_v30, %v4891_v44  ;;  %v2930_v0 = vrot.slane %v4178_v31, %v4891_v44 }
 0xb60   : > { %v3314_v41 = vmul.f32 %v4542_v55, %v5233_v3 }
 0xb61   : > { %v2931_v42 = vcombine.low %v2906_v33, %v2914_v29  ;;  %v2947_v35 = vcombine.low %v2922_v34, %v2930_v0  ;;  %v2932_v36 = vcombine.high %v2906_v33, %v2914_v29  ;;  %v2948_v37 = vcombine.high %v2922_v34, %v2930_v0 }
 0xb63   : > { %v2939_v40 = vrot.slane %v2931_v42, %v4903_v50  ;;  %v2955_v43 = vrot.slane %v2947_v35, %v4903_v50  ;;  %v2946_v45 = vrot.slane %v2932_v36, %v4903_v50  ;;  %v2962_v46 = vrot.slane %v2948_v37, %v4903_v50 }
 0xb65   : > { %v2963_v49 = vcombine.low %v2939_v40, %v2955_v43  ;;  %v2964_v51 = vcombine.high %v2939_v40, %v2955_v43  ;;  %v2965_v56 = vcombine.low %v2946_v45, %v2962_v46  ;;  %v2966_v57 = vcombine.high %v2946_v45, %v2962_v46 }
 0xb67   : > { %4397 = vmatpush3.msra.mxu0 %v2963_v49  ;;  %4402 = vmatpush3.msra.mxu1 %v2964_v51 }
 0xb68   : > { %4399 = vmatmul.mubr.msk.f32.vlgmr.msra.gmra.mxu0 %vm1450_vm2, %v3308_v53  ;;  %4404 = vmatmul.mubr.msk.f32.vlgmr.msra.gmra.mxu1 %vm1450_vm2, %v3310_v54 }
 0xb69   : > { %4406 = vmatprep.subr.mxu0 %v4609_v8  ;;  %4411 = vmatprep.subr.mxu1 %v4609_v8 }
 0xb6a   : > { %4407 = vmatpush3.msra.mxu0 %v2965_v56  ;;  %4412 = vmatpush3.msra.mxu1 %v2966_v57 }
 0xb6b   : > { %4408 = vmatprep.mubr.msk.f32.mxu0 %vm4610_vm1, %v4609_v8  ;;  %4413 = vmatprep.mubr.msk.f32.mxu1 %vm4610_vm1, %v4609_v8 }
 0xb6c   : > { %4409 = vmatmul.mubr.msk.f32.vlgmr.msra.gmra.mxu0 %vm1450_vm2, %v3312_v47  ;;  %4414 = vmatmul.mubr.msk.f32.vlgmr.msra.gmra.mxu1 %vm1450_vm2, %v3314_v41 }
 0xb6d   : > { %4416 = vmatprep.subr.mxu0 %v4609_v8  ;;  %4424 = vmatprep.mubr.msk.f32.mxu0 %vm4610_vm1, %v4609_v8 }
 0xb6e   : > { %4427 = vmatprep.subr.mxu1 %v4609_v8  ;;  %4435 = vmatprep.mubr.msk.f32.mxu1 %vm4610_vm1, %v4609_v8 }
 0xb6f   : > { %4417 = vmatpush3.msra.mxu0 %v2366_v58 }
 0xb70   : > { %4418 = vmatprep.subr.mxu0 %v4609_v8 }
 0xb71   : > { %4419 = vmatpush3.msra.mxu0 %v2365_v63  ;;  %v3957_v63 = vld [vmem:[%s5448_s24 + $0x8] sm:$0xff] }
 0xb72   : > { %4420 = vmatprep.subr.mxu0 %v4609_v8 }
 0xb73   : > { %4421 = vmatpush3.msra.mxu0 %v2364_v61  ;;  %v3956_v61 = vld [vmem:[%s5448_s24] sm:$0xff] }
 0xb74   : > { %4422 = vmatprep.subr.mxu0 %v4609_v8 }
 0xb75   : > { %4423 = vmatpush3.msra.mxu0 %v2363_v26 }
 0xb76   : > { %4438 = vmatprep.subr.mxu0 %v4609_v8 }
 0xc28   : > { %v3384_v52 = vpop.f32.mrf.mxu0  ;;  %v3457_v59 = vpop.f32.mrf.mxu1 }
 0xc2a   : > { %v4400_v60 = vpop.f32.mrf.mxu0  ;;  %v4405_v1 = vpop.f32.mrf.mxu1 }
 0xc2b   : > { %v3870_v60 = vld [vmem:[%s5446_s22 + $0x18] sm:$0xff]  ;;  %v3868_v1 = vld [vmem:[%s5446_s22 + $0x8] sm:$0xff] }
 0xc2c   : > { %v3530_v2 = vpop.f32.mrf.mxu0  ;;  %v3603_v3 = vpop.f32.mrf.mxu1  ;;  %4428 = vmatpush3.msra.mxu1 %v3870_v60 }
 0xc2d   : > { %v3607_v4 = vcombine.low %v3384_v52, %v3530_v2  ;;  %v3608_v5 = vcombine.high %v3384_v52, %v3530_v2  ;;  %v3623_v6 = vcombine.low %v3457_v59, %v3603_v3  ;;  %v3624_v7 = vcombine.high %v3457_v59, %v3603_v3  ;;  %4429 = vmatprep.subr.mxu1 %v4609_v8  ;;  %v3867_v2 = vld [vmem:[%s5446_s22] sm:$0xff] }
 0xc2e   : > { %v4410_v9 = vpop.f32.mrf.mxu0  ;;  %v4415_v10 = vpop.f32.mrf.mxu1 }
 0xc2f   : > { %v3615_v11 = vrot.slane %v3607_v4, %v4891_v44  ;;  %v3622_v12 = vrot.slane %v3608_v5, %v4891_v44  ;;  %v3631_v13 = vrot.slane %v3623_v6, %v4891_v44  ;;  %v3638_v14 = vrot.slane %v3624_v7, %v4891_v44  ;;  %v4195_v7 = vld [vmem:[%s5444_s20] ss:$0 sm:$0xff] }
 0xc30   : > { %v4196_v10 = vld [vmem:[%s5445_s21] ss:$0 sm:$0xff] }
 0xc31   : > { %v3639_v15 = vcombine.low %v3615_v11, %v3631_v13  ;;  %v3640_v16 = vcombine.high %v3615_v11, %v3631_v13  ;;  %v3655_v17 = vcombine.low %v3622_v12, %v3638_v14  ;;  %v3656_v62 = vcombine.high %v3622_v12, %v3638_v14  ;;  %v3963_v13 = vld [vmem:[%s5448_s24 + $0x38] sm:$0xff]  ;;  %v3962_v14 = vld [vmem:[%s5448_s24 + $0x30] sm:$0xff] }
 0xc33   : > { %v3647_v18 = vrot.slane %v3639_v15, %v4903_v50  ;;  %v3654_v19 = vrot.slane %v3640_v16, %v4903_v50  ;;  %v3663_v20 = vrot.slane %v3655_v17, %v4903_v50  ;;  %v3670_v21 = vrot.slane %v3656_v62, %v4903_v50  ;;  %v3961_v15 = vld [vmem:[%s5448_s24 + $0x28] sm:$0xff]  ;;  %v3960_v16 = vld [vmem:[%s5448_s24 + $0x20] sm:$0xff]  ;;  %v3959_v17 = vld [vmem:[%s5448_s24 + $0x18] sm:$0xff] }
 0xc34   : > { %v3958_v62 = vld [vmem:[%s5448_s24 + $0x10] sm:$0xff] }
 0xc35   : > { %v3675_v22 = vcombine.low %v3647_v18, %v3654_v19  ;;  %v4191_v23 = vcombine.high %v3647_v18, %v3654_v19  ;;  %v3691_v24 = vcombine.low %v3663_v20, %v3670_v21  ;;  %v4192_v25 = vcombine.high %v3663_v20, %v3670_v21  ;;  %v4197_v18 = vld [vmem:[%s5447_s23] ss:$0 sm:$0xff] }
 0xc37   : > { %v3682_v27 = vrot.slane %v3675_v22, %v4891_v44  ;;  %v3690_v28 = vrot.slane %v4191_v23, %v4891_v44  ;;  %v3698_v30 = vrot.slane %v3691_v24, %v4891_v44  ;;  %v3706_v31 = vrot.slane %v4192_v25, %v4891_v44 }
 0xc39   : > { %v3708_v33 = vcombine.high %v3682_v27, %v3690_v28  ;;  %v3724_v29 = vcombine.high %v3698_v30, %v3706_v31  ;;  %v3707_v34 = vcombine.low %v3682_v27, %v3690_v28  ;;  %v3723_v0 = vcombine.low %v3698_v30, %v3706_v31 }
 0xc3b   : > { %v3722_v42 = vrot.slane %v3708_v33, %v4903_v50  ;;  %v3738_v35 = vrot.slane %v3724_v29, %v4903_v50  ;;  %v3715_v36 = vrot.slane %v3707_v34, %v4903_v50  ;;  %v3731_v37 = vrot.slane %v3723_v0, %v4903_v50  ;;  %v4193_v50 = vld [vmem:[%s5443_s19] ss:$0 sm:$0xff] }
 0xc3d   : > { %v3741_v38 = vcombine.low %v3722_v42, %v3738_v35  ;;  %v3740_v39 = vcombine.high %v3715_v36, %v3731_v37  ;;  %v3739_v40 = vcombine.low %v3715_v36, %v3731_v37  ;;  %v3742_v44 = vcombine.high %v3722_v42, %v3738_v35 }
 0xc3f   : > { %3748 = vrot.lane.b32.xlu1 %v3741_v38, %s5511_s27  ;;  %3744 = vrot.lane.b32.xlu0 %v3740_v39, %s5512_s7  ;;  %s4136_s27 = sshll.u32 %s793_s0, 3 }
 0xc40   : > { %s795_s9 = scalar_lea.vmem [#allocation2], %s4136_s27  ;;  %s4551_s27 = sshll.u32 %s4620_s8, 4  ;;  %s4552_s27 = int_to_ptr.vmem [resolvable:$false] %s4551_s27 }
 0xc41   : > { %s4061_s11 = sshll.u32 %s795_s9, 4  ;;  %s4553_s7 = scalar_lea.vmem %s4552_s27, 256  ;;  %s4062_s11 = int_to_ptr.vmem [resolvable:$true] %s4061_s11 }
 0xc42   : > { %s4547_s29 = scalar_lea.vmem %s4062_s11, 128  ;;  %p4554_p0 = scmp.lt.s32.totalorder %s4062_s11, %s4552_s27 }
 0xc43   : > { %3752 = vrot.lane.b32.xlu0 %v3742_v44, %s5513_s4  ;;  %p4548_p11 = scmp.ne.s32.totalorder %s4062_s11, %s4547_s29  ;;  %p4555_p1 = scmp.lt.s32.totalorder %s4553_s7, %s4547_s29 }
 0xc45   : > { %p4549_p12 = pnand %p4548_p11, %p4794_p5  ;;  %p4556_p2 = por %p4555_p1, %p4554_p0 }
 0xc47   : > { %p4550_p13 = pneg %p4549_p12 }
 0xc49   : > { %p4557_p3 = pnand %p4556_p2, %p4550_p13 }
 0xcb1   : > { %v3745_v43 = vpop.permute.xlu0 %3744  ;;  %v3749_v45 = vpop.permute.xlu1 %3748 }
 0xcb2   : > { %v3755_v46 = vsel %vm1450_vm2, %v3739_v40, %v3745_v43 }
 0xcb3   : > { %v3756_v49 = vsel %vm2240_vm3, %v3755_v46, %v3749_v45 }
 0xcb5   : > { %v3753_v48 = vpop.permute.xlu0 %3752 }
 0xcb6   : > { %v3757_v51 = vsel %vm2242_vm4, %v3756_v49, %v3753_v48 }
 0xcb7   : > { %4425 = vmatmul.mubr.msk.f32.vlgmr.msra.gmra.mxu0 %vm810_vm0, %v3757_v51 }
 0xcb8   : > { %4454 = vmatprep.mubr.msk.f32.mxu0 %vm4610_vm1, %v4609_v8  ;;  %4439 = vmatpush3.msra.mxu0 %v3963_v13 }
 0xcb9   : > { %4440 = vmatprep.subr.mxu0 %v4609_v8 }
 0xcba   : > { %4441 = vmatpush3.msra.mxu0 %v3962_v14 }
 0xcbb   : > { %4442 = vmatprep.subr.mxu0 %v4609_v8 }
 0xcbc   : > { %4443 = vmatpush3.msra.mxu0 %v3961_v15 }
 0xcbd   : > { %4444 = vmatprep.subr.mxu0 %v4609_v8 }
 0xcbe   : > { %4445 = vmatpush3.msra.mxu0 %v3960_v16 }
 0xcbf   : > { %4446 = vmatprep.subr.mxu0 %v4609_v8 }
 0xcc0   : > { %4447 = vmatpush3.msra.mxu0 %v3959_v17 }
 0xcc1   : > { %4448 = vmatprep.subr.mxu0 %v4609_v8 }
 0xcc2   : > { %4449 = vmatpush3.msra.mxu0 %v3958_v62 }
 0xcc3   : > { %4450 = vmatprep.subr.mxu0 %v4609_v8 }
 0xcc4   : > { %4451 = vmatpush3.msra.mxu0 %v3957_v63 }
 0xcc5   : > { %4452 = vmatprep.subr.mxu0 %v4609_v8 }
 0xcc6   : > { %4453 = vmatpush3.msra.mxu0 %v3956_v61 }
 0xd77   : > { %v3833_v53 = vpop.f32.mrf.mxu0 }
 0xd78   : > { %v3834_v54 = vadd.f32 %v4193_v50, %v3833_v53 }
 0xd79   : > { %v4426_v55 = vpop.f32.mrf.mxu0 }
 0xd7a   : > { %v5323_v56 = vadd.f32 %v3834_v54, %v5069_v32  ;;  %v3869_v32 = vld [vmem:[%s5446_s22 + $0x10] sm:$0xff] }
 0xd7b   : > { %4430 = vmatpush3.msra.mxu1 %v3869_v32 }
 0xd7c   : > { %v3840_v57 = vsel %vm810_vm0, %v5323_v56, 0.0  ;;  %4431 = vmatprep.subr.mxu1 %v4609_v8 }
 0xd7d   : > { %3841 = vadd.xlane.f32.xlu1 %v3840_v57  ;;  %4432 = vmatpush3.msra.mxu1 %v3868_v1 }
 0xd7e   : > { %4433 = vmatprep.subr.mxu1 %v4609_v8  ;;  %v4199_v8 = vld [vmem:[%s5449_s25] ss:$0 sm:$0xff] }
 0xd7f   : > { %4434 = vmatpush3.msra.mxu1 %v3867_v2 }
 0xe06   : > { %v3842_v47 = vpop.xlane.xlu1 %3841 }
 0xe07   : > { %v3843_v41 = vmul.f32 0.03125, %v3842_v47 }
 0xe09   : > { %v3844_v58 = vsub.f32 %v5323_v56, %v3843_v41 }
 0xe0b   : > { %v3845_v52 = vmul.f32 %v3844_v58, %v3844_v58 }
 0xe0d   : > { %v3846_v59 = vsel %vm810_vm0, %v3845_v52, 0.0 }
 0xe0e   : > { %3847 = vadd.xlane.f32.xlu0 %v3846_v59 }
 0xe97   : > { %v3848_v3 = vpop.xlane.xlu0 %3847 }
 0xe98   : > { %v3849_v4 = vmul.f32 0.03125, %v3848_v3 }
 0xe9a   : > { %v3850_v5 = vadd.f32 1e-06, %v3849_v4 }
 0xe9c   : > { %4543 = vrsqrt.f32 %v3850_v5 }
 0xea9   : > { %v4544_v6 = vpop.eup %4543 }
 0xeaa   : > { %v3852_v9 = vmul.f32 %v4544_v6, %v3844_v58 }
 0xeac   : > { %v3859_v11 = vmul.f32 %v4195_v7, %v3852_v9 }
 0xeae   : > { %v3866_v12 = vadd.f32 %v4196_v10, %v3859_v11 }
 0xeb0   : > { %4436 = vmatmul.mubr.msk.f32.vlgmr.msra.gmra.mxu1 %vm810_vm0, %v3866_v12 }
 0xf70   : > { %v3947_v19 = vpop.f32.mrf.mxu1 }
 0xf71   : > { %v3948_v20 = vadd.f32 %v4197_v18, %v3947_v19 }
 0xf72   : > { %v4437_v21 = vpop.f32.mrf.mxu1 }
 0xf73   : > { %v3952_v22 = vmul.f32 0.70710677, %v3948_v20  ;;  %v3951_v24 = vmul.f32 0.5, %v3948_v20 }
 0xf75   : > { %4545 = verf.f32 %v3952_v22 }
 0xf82   : > { %v4546_v23 = vpop.eup %4545 }
 0xf83   : > { %v3954_v25 = vadd.f32 1.0, %v4546_v23 }
 0xf85   : > { %v3955_v26 = vmul.f32 %v3954_v25, %v3951_v24 }
 0xf87   : > { %4455 = vmatmul.mubr.msk.f32.vlgmr.msra.gmra.mxu0 %vm3971_vm5, %v3955_v26 }
0x1047   : > { %v4041_v27 = vpop.f32.mrf.mxu0 }
0x1048   : > { %v4042_v28 = vadd.f32 %v4199_v8, %v4041_v27 }
0x1049   : > { %v4456_v30 = vpop.f32.mrf.mxu0 }
0x104a   : > { %v4045_v31 = vadd.f32 %v4042_v28, %v5323_v56 }
0x104c   : > { %4046 = vst.msk [vmem:[%s795_s9] sm:$0xff] %vm810_vm0, %v4045_v31 }
0x104d   : > { %4560 = shalt.err (!%p4557_p3)
}
0x104e   : > { %s4561_s4 = scalar_lea.hbm %s4059_s6, 128  ;;  %s4565_s9 = scalar_lea.hbm %s5450_s26, 256 }
0x104f   : > { %p4562_p4 = scmp.ne.s32.totalorder %s4059_s6, %s4561_s4  ;;  %p4566_p9 = scmp.lt.s32.totalorder %s4059_s6, %s5450_s26 }
0x1050   : > { %p4567_p10 = scmp.lt.s32.totalorder %s4565_s9, %s4561_s4 }
0x1051   : > { %p4563_p7 = pnand %p4562_p4, %p4794_p5 }
0x1052   : > { %p4568_p11 = por %p4567_p10, %p4566_p9 }
0x1053   : > { %p4564_p8 = pneg %p4563_p7 }
0x1055   : > { %p4569_p12 = pnand %p4568_p11, %p4564_p8 }
0x1057   : > { %4572 = shalt.err (!%p4569_p12)
}
0x1058   : > { %4457 = dma.vmem_to_hbm [thread:$0]  (%p4794_p5), %s4062_s11, 128, %s4059_s6, %s4048_s1  }
0x1059 PF: > { %s5514_s29 = sld [smem:[#allocation7_spill]] }
0x105a   : > { %s5515_s8 = sld [smem:[#allocation5_spill]] }
0x105f   : > { %p4463_p13 = scmp.ge.s32.totalorder %s5514_s29, 2 }
0x1060   : > { %s4073_s7 = sand.u32 1, %s5515_s8  }
0x1061   : > { %p4460_p0 = pnand %p4463_p13, %p4798_p6  ;;  %s4074_s0 = scalar_lea.sflag [#allocation3], %s4073_s7 }
0x1063   : > { %p4461_p1 = pneg %p4460_p0 }
0x1065   : > { %4590 = dma.done.wait (%p4461_p1), %s4074_s0, 128  }
0x1066   : > { %4592 = vsyncadd (%p4461_p1), %s4074_s0, 4294967168  ;;  %s5517_s28 = sld [smem:[#allocation8_spill]]  ;;  %s5520_s27 = smov %s4599_s3 }
0x1067   : > { %s5518_s4 = sld [smem:[#allocation6_spill]] }
0x1068   : > { %s5519_s7 = sld [smem:[#allocation9_spill]] }
0x106c   : > { %p36_p2 = scmp.ge.s32.totalorder %s5517_s28, 4  }
0x106d   : > { %s5521_s3 = smov %s5518_s4 }
0x106e   :  { %38 = sbr.rel (!%p36_p2) target bundleno = 16 (0x10), region = 162 }
0x1073   :  { %4079 = vsyncpa [#allocation3], 1 }
0x1074   :  { %4081 = vsyncpa [#allocation3 + $0x1], 1 }

</bundles_post_ra>
